<compile_context>
chip_gen: v6e
topology: v6e:2x2x1
jax: 0.10.0
libtpu: 0.0.40
codegen_flags: <defaults>
</compile_context>

<pallas_src>
import math

import jax
import jax.numpy as jnp
from jax.experimental import pallas as pl
from jax.experimental.pallas import tpu as pltpu

BN_EPS = 1e-5


# ---------------------------------------------------------------------------
# Fused kernel: y = relu(relu((x*scale+shift) @ W1 + b1) @ W2 + b2)
# ---------------------------------------------------------------------------
def _embed_kernel(x_ref, s_ref, t_ref, w1_ref, b1_ref, w2_ref, b2_ref, o_ref):
    x = x_ref[0]                                     # (M, C)  f32
    xn = x * s_ref[...] + t_ref[...]                 # folded BN affine, f32

    h = jnp.dot(xn.astype(jnp.bfloat16), w1_ref[...],
                preferred_element_type=jnp.float32)  # (M, 64) f32 accum
    h = jnp.maximum(h + b1_ref[...], 0.0)

    y = jnp.dot(h.astype(jnp.bfloat16), w2_ref[...],
                preferred_element_type=jnp.float32)  # (M, 128) f32 accum
    o_ref[0] = jnp.maximum(y + b2_ref[...], 0.0)     # lane-dense 128-wide store


@jax.jit
def embed_forward(params, x):
    """x: (N, C, V, T) float32  ->  (N, out_channels, V, T) float32."""
    N, C, V, T = x.shape
    M = T * V

    # Fold BatchNorm1d(C*V) running stats into a per-(v, c) scale / shift.
    gamma = params["bn_gamma"].reshape(C, V)
    beta = params["bn_beta"].reshape(C, V)
    mean = params["bn_mean"].reshape(C, V)
    var = params["bn_var"].reshape(C, V)
    scale_cv = gamma * jax.lax.rsqrt(var + BN_EPS)
    shift_cv = beta - mean * scale_cv
    scale = jnp.broadcast_to(scale_cv.T[None], (T, V, C)).reshape(M, C)
    shift = jnp.broadcast_to(shift_cv.T[None], (T, V, C)).reshape(M, C)

    # NCVT -> N,(T*V),C  (channel-last so the 1x1 convs are matmuls)
    x_flat = jnp.transpose(x, (0, 3, 2, 1)).reshape(N, M, C)

    w1 = params["w1"].astype(jnp.bfloat16)           # (C,  64)
    w2 = params["w2"].astype(jnp.bfloat16)           # (64, 128)
    b1 = params["b1"].reshape(1, -1)                 # (1,  64)  f32
    b2 = params["b2"].reshape(1, -1)                 # (1, 128)  f32
    cmid = w1.shape[1]
    cout = w2.shape[1]

    out = pl.pallas_call(
        _embed_kernel,
        out_shape=jax.ShapeDtypeStruct((N, M, cout), jnp.float32),
        grid=(N,),
        in_specs=[
            pl.BlockSpec((1, M, C), lambda n: (n, 0, 0)),      # x
            pl.BlockSpec((M, C), lambda n: (0, 0)),            # BN scale
            pl.BlockSpec((M, C), lambda n: (0, 0)),            # BN shift
            pl.BlockSpec((C, cmid), lambda n: (0, 0)),         # W1
            pl.BlockSpec((1, cmid), lambda n: (0, 0)),         # b1
            pl.BlockSpec((cmid, cout), lambda n: (0, 0)),      # W2
            pl.BlockSpec((1, cout), lambda n: (0, 0)),         # b2
        ],
        out_specs=pl.BlockSpec((1, M, cout), lambda n: (n, 0, 0)),
        compiler_params=pltpu.CompilerParams(
            dimension_semantics=("parallel",)),
    )(x_flat, scale, shift, w1, b1, w2, b2)

    # back to the PyTorch layout (N, Cout, V, T)
    return jnp.transpose(out.reshape(N, T, V, cout), (0, 3, 2, 1))


# ---------------------------------------------------------------------------
# Parameter construction (mirrors PyTorch default inits) + pure-JAX reference
# ---------------------------------------------------------------------------
def init_params(key, in_channels=3, mid=64, out_channels=128, num_node=25):
    k1, k2, k3, k4 = jax.random.split(key, 4)
    bnd1 = 1.0 / math.sqrt(in_channels)              # 1x1 conv fan_in = C
    bnd2 = 1.0 / math.sqrt(mid)
    nc = in_channels * num_node
    return {
        "w1": jax.random.uniform(k1, (in_channels, mid), jnp.float32, -bnd1, bnd1),
        "b1": jax.random.uniform(k2, (mid,), jnp.float32, -bnd1, bnd1),
        "w2": jax.random.uniform(k3, (mid, out_channels), jnp.float32, -bnd2, bnd2),
        "b2": jax.random.uniform(k4, (out_channels,), jnp.float32, -bnd2, bnd2),
        "bn_gamma": jnp.ones((nc,), jnp.float32),
        "bn_beta": jnp.zeros((nc,), jnp.float32),
        "bn_mean": jnp.zeros((nc,), jnp.float32),
        "bn_var": jnp.ones((nc,), jnp.float32),
    }


def embed_reference(params, x):
    N, C, V, T = x.shape
    g = params["bn_gamma"].reshape(C, V)
    b = params["bn_beta"].reshape(C, V)
    m = params["bn_mean"].reshape(C, V)
    v = params["bn_var"].reshape(C, V)
    s = g * jax.lax.rsqrt(v + BN_EPS)
    xn = x * s[None, :, :, None] + (b - m * s)[None, :, :, None]
    h = jnp.einsum("ncvt,cd->ndvt", xn, params["w1"]) + params["b1"][None, :, None, None]
    h = jnp.maximum(h, 0.0)
    y = jnp.einsum("ncvt,cd->ndvt", h, params["w2"]) + params["b2"][None, :, None, None]
    return jnp.maximum(y, 0.0)


if __name__ == "__main__":
    N, C, V, T = 2, 3, 25, 16                        # skeleton: 3 coords, 25 joints
    params = init_params(jax.random.PRNGKey(1), in_channels=C, mid=64,
                         out_channels=128, num_node=V)
    x = jax.random.normal(jax.random.PRNGKey(0), (N, C, V, T), dtype=jnp.float32)

    out = embed_forward(params, x)
    out = jax.block_until_ready(out)

    assert out.shape == (N, 128, V, T), out.shape
    assert bool(jnp.all(jnp.isfinite(out)))

    ref = embed_reference(params, x)
    assert bool(jnp.allclose(out, ref, rtol=5e-2, atol=1e-1)), (
        float(jnp.max(jnp.abs(out - ref))))

    print("KERNEL_OK")
</pallas_src>

<mosaic_0001>
module attributes {stable_mosaic.version = 11 : i64} {
  func.func @_embed_kernel(%arg0: i32, %arg1: memref<1x400x3xf32, #tpu.memory_space<vmem>>, %arg2: memref<400x3xf32, #tpu.memory_space<vmem>>, %arg3: memref<400x3xf32, #tpu.memory_space<vmem>>, %arg4: memref<3x64xbf16, #tpu.memory_space<vmem>>, %arg5: memref<1x64xf32, #tpu.memory_space<vmem>>, %arg6: memref<64x128xbf16, #tpu.memory_space<vmem>>, %arg7: memref<1x128xf32, #tpu.memory_space<vmem>>, %arg8: memref<1x400x128xf32, #tpu.memory_space<vmem>>) attributes {dimension_semantics = [#tpu.dimension_semantics<parallel>], iteration_bounds = array<i64: 2>, scalar_prefetch = 0 : i64, scratch_operands = 0 : i64, tpu.core_type = #tpu.core_type<tc>, window_params = [{transform_indices = @transform_0, window_bounds = array<i64: 1, 400, 3>}, {pipeline_mode = #tpu.pipeline_mode<synchronous>, transform_indices = @transform_1, window_bounds = array<i64: 400, 3>}, {pipeline_mode = #tpu.pipeline_mode<synchronous>, transform_indices = @transform_2, window_bounds = array<i64: 400, 3>}, {pipeline_mode = #tpu.pipeline_mode<synchronous>, transform_indices = @transform_3, window_bounds = array<i64: 3, 64>}, {pipeline_mode = #tpu.pipeline_mode<synchronous>, transform_indices = @transform_4, window_bounds = array<i64: 1, 64>}, {pipeline_mode = #tpu.pipeline_mode<synchronous>, transform_indices = @transform_5, window_bounds = array<i64: 64, 128>}, {pipeline_mode = #tpu.pipeline_mode<synchronous>, transform_indices = @transform_6, window_bounds = array<i64: 1, 128>}, {transform_indices = @transform_7, window_bounds = array<i64: 1, 400, 128>}]} {
    %c0 = arith.constant 0 : index
    %c0_0 = arith.constant 0 : index
    %c0_1 = arith.constant 0 : index
    %0 = vector.load %arg1[%c0, %c0_0, %c0_1] : memref<1x400x3xf32, #tpu.memory_space<vmem>>, vector<1x400x3xf32>
    %1 = vector.shape_cast %0 : vector<1x400x3xf32> to vector<400x3xf32>
    %c0_2 = arith.constant 0 : index
    %c0_3 = arith.constant 0 : index
    %2 = vector.load %arg2[%c0_2, %c0_3] : memref<400x3xf32, #tpu.memory_space<vmem>>, vector<400x3xf32>
    %3 = arith.mulf %1, %2 : vector<400x3xf32>
    %c0_4 = arith.constant 0 : index
    %c0_5 = arith.constant 0 : index
    %4 = vector.load %arg3[%c0_4, %c0_5] : memref<400x3xf32, #tpu.memory_space<vmem>>, vector<400x3xf32>
    %5 = arith.addf %3, %4 : vector<400x3xf32>
    %6 = arith.truncf %5 : vector<400x3xf32> to vector<400x3xbf16>
    %c0_6 = arith.constant 0 : index
    %c0_7 = arith.constant 0 : index
    %7 = vector.load %arg4[%c0_6, %c0_7] : memref<3x64xbf16, #tpu.memory_space<vmem>>, vector<3x64xbf16>
    %cst = arith.constant dense<0.000000e+00> : vector<400x64xf32>
    %8 = tpu.matmul %6, %7, %cst {dimension_numbers = #tpu.dot_dimension_numbers<[1], [0], [0], [1], [0, 0, 1, 1], [], []>} : vector<400x3xbf16>, vector<3x64xbf16>, vector<400x64xf32> -> vector<400x64xf32>
    %c0_8 = arith.constant 0 : index
    %c0_9 = arith.constant 0 : index
    %9 = vector.load %arg5[%c0_8, %c0_9] : memref<1x64xf32, #tpu.memory_space<vmem>>, vector<1x64xf32>
    %10 = vector.broadcast %9 : vector<1x64xf32> to vector<400x64xf32>
    %11 = arith.addf %8, %10 : vector<400x64xf32>
    %cst_10 = arith.constant 0.000000e+00 : f32
    %12 = vector.broadcast %cst_10 : f32 to vector<400x64xf32>
    %13 = arith.maximumf %11, %12 : vector<400x64xf32>
    %14 = arith.truncf %13 : vector<400x64xf32> to vector<400x64xbf16>
    %c0_11 = arith.constant 0 : index
    %c0_12 = arith.constant 0 : index
    %15 = vector.load %arg6[%c0_11, %c0_12] : memref<64x128xbf16, #tpu.memory_space<vmem>>, vector<64x128xbf16>
    %cst_13 = arith.constant dense<0.000000e+00> : vector<400x128xf32>
    %16 = tpu.matmul %14, %15, %cst_13 {dimension_numbers = #tpu.dot_dimension_numbers<[1], [0], [0], [1], [0, 0, 1, 1], [], []>} : vector<400x64xbf16>, vector<64x128xbf16>, vector<400x128xf32> -> vector<400x128xf32>
    %c0_14 = arith.constant 0 : index
    %c0_15 = arith.constant 0 : index
    %17 = vector.load %arg7[%c0_14, %c0_15] : memref<1x128xf32, #tpu.memory_space<vmem>>, vector<1x128xf32>
    %18 = vector.broadcast %17 : vector<1x128xf32> to vector<400x128xf32>
    %19 = arith.addf %16, %18 : vector<400x128xf32>
    %cst_16 = arith.constant 0.000000e+00 : f32
    %20 = vector.broadcast %cst_16 : f32 to vector<400x128xf32>
    %21 = arith.maximumf %19, %20 : vector<400x128xf32>
    %c0_17 = arith.constant 0 : index
    %c0_18 = arith.constant 0 : index
    %c0_19 = arith.constant 0 : index
    %22 = vector.load %arg8[%c0_17, %c0_18, %c0_19] : memref<1x400x128xf32, #tpu.memory_space<vmem>>, vector<1x400x128xf32>
    %23 = vector.shape_cast %22 : vector<1x400x128xf32> to vector<400x128xf32>
    %24 = vector.shape_cast %21 : vector<400x128xf32> to vector<1x400x128xf32>
    tpu.vector_store %arg8[%c0_17, %c0_18, %c0_19], %24 {strides = array<i32>} : memref<1x400x128xf32, #tpu.memory_space<vmem>>, vector<1x400x128xf32>,
    return
  }
  func.func @transform_0(%arg0: i32) -> (i32, i32, i32) {
    %c0_i32 = arith.constant 0 : i32
    %c0_i32_0 = arith.constant 0 : i32
    %c0_i32_1 = arith.constant 0 : i32
    return %arg0, %c0_i32, %c0_i32_0 : i32, i32, i32
  }
  func.func @transform_1(%arg0: i32) -> (i32, i32) {
    %c0_i32 = arith.constant 0 : i32
    %c0_i32_0 = arith.constant 0 : i32
    %c0_i32_1 = arith.constant 0 : i32
    return %c0_i32, %c0_i32_0 : i32, i32
  }
  func.func @transform_2(%arg0: i32) -> (i32, i32) {
    %c0_i32 = arith.constant 0 : i32
    %c0_i32_0 = arith.constant 0 : i32
    %c0_i32_1 = arith.constant 0 : i32
    return %c0_i32, %c0_i32_0 : i32, i32
  }
  func.func @transform_3(%arg0: i32) -> (i32, i32) {
    %c0_i32 = arith.constant 0 : i32
    %c0_i32_0 = arith.constant 0 : i32
    %c0_i32_1 = arith.constant 0 : i32
    return %c0_i32, %c0_i32_0 : i32, i32
  }
  func.func @transform_4(%arg0: i32) -> (i32, i32) {
    %c0_i32 = arith.constant 0 : i32
    %c0_i32_0 = arith.constant 0 : i32
    %c0_i32_1 = arith.constant 0 : i32
    return %c0_i32, %c0_i32_0 : i32, i32
  }
  func.func @transform_5(%arg0: i32) -> (i32, i32) {
    %c0_i32 = arith.constant 0 : i32
    %c0_i32_0 = arith.constant 0 : i32
    %c0_i32_1 = arith.constant 0 : i32
    return %c0_i32, %c0_i32_0 : i32, i32
  }
  func.func @transform_6(%arg0: i32) -> (i32, i32) {
    %c0_i32 = arith.constant 0 : i32
    %c0_i32_0 = arith.constant 0 : i32
    %c0_i32_1 = arith.constant 0 : i32
    return %c0_i32, %c0_i32_0 : i32, i32
  }
  func.func @transform_7(%arg0: i32) -> (i32, i32, i32) {
    %c0_i32 = arith.constant 0 : i32
    %c0_i32_0 = arith.constant 0 : i32
    %c0_i32_1 = arith.constant 0 : i32
    return %arg0, %c0_i32, %c0_i32_0 : i32, i32, i32
  }
}

</mosaic_0001>

<bundles_post_ra>
// kernel: embed_forward.1
= control target key start
LH: loop header
LB: loop body
LE: loop exit
PB: predicated region body
PF: predicated region fallthrough
CT: control target
= control target key end

     0   :  { %s1854_s24 = smov 0   ;;  %s2562_s0 = inlined_call_operand.vmem [shape: f32[2,400,3], index: 0, kind: input, shape index: {}]   ;;  %s2563_s1 = inlined_call_operand.vmem [shape: f32[400,3], index: 1, kind: input, shape index: {}]   ;;  %s2564_s2 = inlined_call_operand.vmem [shape: f32[400,3], index: 2, kind: input, shape index: {}]   ;;  %s2565_s3 = inlined_call_operand.vmem [shape: bf16[3,64], index: 3, kind: input, shape index: {}]   ;;  %s2566_s4 = inlined_call_operand.vmem [shape: f32[1,64], index: 4, kind: input, shape index: {}]   ;;  %s2567_s5 = inlined_call_operand.vmem [shape: bf16[64,128], index: 5, kind: input, shape index: {}]   ;;  %s2568_s6 = inlined_call_operand.vmem [shape: f32[1,128], index: 6, kind: input, shape index: {}]   ;;  %s2569_s7 = inlined_call_operand.vmem [shape: f32[2,400,128], index: 7, kind: output, shape index: {}]  }
   0x1 LB: > { %s1457_s25 = sadd.s32 4294967295, %s1809_s24   ;;  %p1461_p0 = scmp.ge.s32.totalorder %s1809_s24, 1  ;;  %s1809_s24 = sphi %s1854_s24, %s17_s24  }
   0x2   : > { %p237_p1 = scmp.lt.s32.totalorder %s1809_s24, 3 }
   0x4   : > { %p238_p2 = pnand %p1461_p0, %p237_p1 }
   0x5   : > { %p269_p3 = scmp.lt.s32.totalorder (!%p238_p2), %s1457_s25, 1 }
   0x6   : > { %241 = sbr.rel (%p238_p2) target bundleno = 620 (0x26c), region = 48 }
   0xb   : > { %v555_v0 = vld [vmem:[%s2565_s3] sm:$0x3]  ;;  %vm639_vm0 = vcmask 1040384   ;;  %vm640_vm1 = vcmask 1041408   ;;  %v1811_v1 = vmov 0.0   ;;  %v1812_v2 = vmov 65535  }
   0xc   : > { %1577 = vmatprep.subr.bf16.mxu0 %v1811_v1  ;;  %v641_v3 = vsel %vm639_vm0, 4294967295, %v1812_v2  ;;  %1679 = vmatprep.subr.bf16.mxu1 %v1811_v1  ;;  %vm1813_vm2 = vmmov 0   ;;  %s2571_s25 = smov (!%p269_p3, %s1457_s25), 1  ;;  %v330_v6 = vld [vmem:[%s2563_s1] sm:$0xff]  ;;  %v331_v7 = vld [vmem:[%s2563_s1 + $0x8] sm:$0xff]  ;;  %v332_v10 = vld [vmem:[%s2563_s1 + $0x10] sm:$0xff] }
   0xd   : > { %v642_v4 = vsel %vm640_vm1, %v641_v3, 0  ;;  %1579 = vmatprep.mubr.msk.bf16.mxu0 %vm1813_vm2, %v1811_v1  ;;  %1687 = vmatprep.mubr.msk.bf16.mxu1 %vm1813_vm2, %v1811_v1  ;;  %s1787_s28 = smul.u32 400, %s2571_s25  ;;  %v430_v8 = vld [vmem:[%s2564_s2] sm:$0xff]  ;;  %v431_v9 = vld [vmem:[%s2564_s2 + $0x8] sm:$0xff]  ;;  %v333_v11 = vld [vmem:[%s2563_s1 + $0x18] sm:$0xff]  ;;  %vm563_vm3 = vcmask 23552  }
   0xe   : > { %v644_v5 = vand.u32 %v642_v4, %v555_v0  ;;  %v432_v22 = vld [vmem:[%s2564_s2 + $0x10] sm:$0xff]  ;;  %v433_v23 = vld [vmem:[%s2564_s2 + $0x18] sm:$0xff]  ;;  %v334_v27 = vld [vmem:[%s2563_s1 + $0x20] sm:$0xff]  ;;  %vm993_vm4 = vcmask 523264  }
   0xf   : > { %s1888_s14 = scalar_lea.vmem %s2562_s0, %s1787_s28  ;;  %v335_v30 = vld [vmem:[%s2563_s1 + $0x28] sm:$0xff]  ;;  %v434_v34 = vld [vmem:[%s2564_s2 + $0x20] sm:$0xff]  ;;  %v336_v38 = vld [vmem:[%s2563_s1 + $0x30] sm:$0xff]  ;;  %s2458_s12 = scalar_lea.vmem %s2569_s7, %s1787_s28 }
  0x10   : > { %1578 = vmatpush3.bf16.msra.mxu0 %v644_v5  ;;  %v280_v12 = vld [vmem:[%s1888_s14] sm:$0xff]  ;;  %v281_v13 = vld [vmem:[%s1888_s14 + $0x8] sm:$0xff]  ;;  %v282_v14 = vld [vmem:[%s1888_s14 + $0x10] sm:$0xff] }
  0x11   : > { %v380_v15 = vmul.f32 %v330_v6, %v280_v12  ;;  %v381_v16 = vmul.f32 %v331_v7, %v281_v13  ;;  %v283_v17 = vld [vmem:[%s1888_s14 + $0x18] sm:$0xff]  ;;  %v382_v20 = vmul.f32 %v332_v10, %v282_v14  ;;  %v284_v28 = vld [vmem:[%s1888_s14 + $0x20] sm:$0xff]  ;;  %v285_v29 = vld [vmem:[%s1888_s14 + $0x28] sm:$0xff] }
  0x12   : > { %v383_v21 = vmul.f32 %v333_v11, %v283_v17  ;;  %v384_v32 = vmul.f32 %v334_v27, %v284_v28  ;;  %v385_v33 = vmul.f32 %v335_v30, %v285_v29  ;;  %v435_v35 = vld [vmem:[%s2564_s2 + $0x28] sm:$0xff]  ;;  %v286_v39 = vld [vmem:[%s1888_s14 + $0x30] sm:$0xff]  ;;  %v287_v40 = vld [vmem:[%s1888_s14 + $0x38] sm:$0xff] }
  0x13   : > { %v480_v18 = vadd.f32 %v430_v8, %v380_v15  ;;  %v481_v19 = vadd.f32 %v431_v9, %v381_v16  ;;  %v482_v25 = vadd.f32 %v432_v22, %v382_v20  ;;  %v337_v41 = vld [vmem:[%s2563_s1 + $0x38] sm:$0xff]  ;;  %v386_v43 = vmul.f32 %v336_v38, %v286_v39  ;;  %v436_v45 = vld [vmem:[%s2564_s2 + $0x30] sm:$0xff]  ;;  %v338_v49 = vld [vmem:[%s2563_s1 + $0x40] sm:$0xff] }
  0x14   : > { %v483_v26 = vadd.f32 %v433_v23, %v383_v21  ;;  %v484_v36 = vadd.f32 %v434_v34, %v384_v32  ;;  %v485_v37 = vadd.f32 %v435_v35, %v385_v33  ;;  %v387_v44 = vmul.f32 %v337_v41, %v287_v40  ;;  %v437_v46 = vld [vmem:[%s2564_s2 + $0x38] sm:$0xff]  ;;  %v288_v50 = vld [vmem:[%s1888_s14 + $0x40] sm:$0xff]  ;;  %v289_v51 = vld [vmem:[%s1888_s14 + $0x48] sm:$0xff] }
  0x15   : > { %v530_v24 = vpack.c.bf16 %v481_v19, %v480_v18  ;;  %v486_v47 = vadd.f32 %v436_v45, %v386_v43  ;;  %v339_v52 = vld [vmem:[%s2563_s1 + $0x48] sm:$0xff]  ;;  %v388_v54 = vmul.f32 %v338_v49, %v288_v50  ;;  %v438_v56 = vld [vmem:[%s2564_s2 + $0x40] sm:$0xff]  ;;  %v340_v60 = vld [vmem:[%s2563_s1 + $0x50] sm:$0xff] }
  0x16   : > { %v531_v31 = vpack.c.bf16 %v483_v26, %v482_v25  ;;  %v532_v42 = vpack.c.bf16 %v485_v37, %v484_v36  ;;  %v487_v48 = vadd.f32 %v437_v46, %v387_v44  ;;  %v389_v55 = vmul.f32 %v339_v52, %v289_v51  ;;  %v439_v57 = vld [vmem:[%s2564_s2 + $0x48] sm:$0xff]  ;;  %v290_v61 = vld [vmem:[%s1888_s14 + $0x50] sm:$0xff]  ;;  %v291_v62 = vld [vmem:[%s1888_s14 + $0x58] sm:$0xff] }
  0x17   : > { %1580 = vmatmul.mubr.msk.bf16.vlgmr.msra.gmra.mxu0 %vm563_vm3, %v530_v24  ;;  %v488_v58 = vadd.f32 %v438_v56, %v388_v54  ;;  %v341_v63 = vld [vmem:[%s2563_s1 + $0x58] sm:$0xff]  ;;  %v440_v0 = vld [vmem:[%s2564_s2 + $0x50] sm:$0xff]  ;;  %v390_v4 = vmul.f32 %v340_v60, %v290_v61  ;;  %v292_v8 = vld [vmem:[%s1888_s14 + $0x60] sm:$0xff] }
  0x18   : > { %1583 = vmatprep.mubr.msk.bf16.mxu0 %vm1813_vm2, %v1811_v1  ;;  %v533_v53 = vpack.c.bf16 %v487_v48, %v486_v47  ;;  %v489_v59 = vadd.f32 %v439_v57, %v389_v55  ;;  %v441_v2 = vld [vmem:[%s2564_s2 + $0x58] sm:$0xff]  ;;  %v391_v5 = vmul.f32 %v341_v63, %v291_v62  ;;  %v293_v9 = vld [vmem:[%s1888_s14 + $0x68] sm:$0xff]  ;;  %v342_v10 = vld [vmem:[%s2563_s1 + $0x60] sm:$0xff] }
  0x19   : > { %v490_v6 = vadd.f32 %v440_v0, %v390_v4  ;;  %v343_v11 = vld [vmem:[%s2563_s1 + $0x68] sm:$0xff]  ;;  %v392_v13 = vmul.f32 %v342_v10, %v292_v8  ;;  %v442_v15 = vld [vmem:[%s2564_s2 + $0x60] sm:$0xff]  ;;  %v294_v19 = vld [vmem:[%s1888_s14 + $0x70] sm:$0xff] }
  0x1a   : > { %v534_v3 = vpack.c.bf16 %v489_v59, %v488_v58  ;;  %v491_v7 = vadd.f32 %v441_v2, %v391_v5  ;;  %v393_v14 = vmul.f32 %v343_v11, %v293_v9  ;;  %v443_v16 = vld [vmem:[%s2564_s2 + $0x68] sm:$0xff]  ;;  %v295_v20 = vld [vmem:[%s1888_s14 + $0x78] sm:$0xff]  ;;  %v344_v21 = vld [vmem:[%s2563_s1 + $0x70] sm:$0xff] }
  0x1b   : > { %v492_v17 = vadd.f32 %v442_v15, %v392_v13  ;;  %v345_v22 = vld [vmem:[%s2563_s1 + $0x78] sm:$0xff]  ;;  %v394_v24 = vmul.f32 %v344_v21, %v294_v19  ;;  %v444_v26 = vld [vmem:[%s2564_s2 + $0x70] sm:$0xff]  ;;  %v296_v30 = vld [vmem:[%s1888_s14 + $0x80] sm:$0xff] }
  0x1c   : > { %v535_v12 = vpack.c.bf16 %v491_v7, %v490_v6  ;;  %v493_v18 = vadd.f32 %v443_v16, %v393_v14  ;;  %v395_v25 = vmul.f32 %v345_v22, %v295_v20  ;;  %v445_v27 = vld [vmem:[%s2564_s2 + $0x78] sm:$0xff]  ;;  %v346_v32 = vld [vmem:[%s2563_s1 + $0x80] sm:$0xff]  ;;  %v347_v33 = vld [vmem:[%s2563_s1 + $0x88] sm:$0xff] }
  0x1d   : > { %v494_v28 = vadd.f32 %v444_v26, %v394_v24  ;;  %v396_v35 = vmul.f32 %v346_v32, %v296_v30  ;;  %v446_v37 = vld [vmem:[%s2564_s2 + $0x80] sm:$0xff]  ;;  %v447_v38 = vld [vmem:[%s2564_s2 + $0x88] sm:$0xff]  ;;  %v298_v41 = vld [vmem:[%s1888_s14 + $0x90] sm:$0xff] }
  0x1e   : > { %v536_v23 = vpack.c.bf16 %v493_v18, %v492_v17  ;;  %v495_v29 = vadd.f32 %v445_v27, %v395_v25  ;;  %v299_v43 = vld [vmem:[%s1888_s14 + $0x98] sm:$0xff]  ;;  %v348_v44 = vld [vmem:[%s2563_s1 + $0x90] sm:$0xff]  ;;  %v300_v54 = vld [vmem:[%s1888_s14 + $0xa0] sm:$0xff] }
  0x1f   : > { %1584 = vmatmul.mubr.msk.bf16.gmra.mxu0 %vm563_vm3, %v531_v31  ;;  %v297_v31 = vld [vmem:[%s1888_s14 + $0x88] sm:$0xff]  ;;  %v496_v39 = vadd.f32 %v446_v37, %v396_v35  ;;  %v349_v45 = vld [vmem:[%s2563_s1 + $0x98] sm:$0xff]  ;;  %v398_v47 = vmul.f32 %v348_v44, %v298_v41  ;;  %v448_v49 = vld [vmem:[%s2564_s2 + $0x90] sm:$0xff] }
  0x20   : > { %1587 = vmatprep.mubr.msk.bf16.mxu0 %vm1813_vm2, %v1811_v1  ;;  %v537_v34 = vpack.c.bf16 %v495_v29, %v494_v28  ;;  %v397_v36 = vmul.f32 %v347_v33, %v297_v31  ;;  %v399_v48 = vmul.f32 %v349_v45, %v299_v43  ;;  %v449_v50 = vld [vmem:[%s2564_s2 + $0x98] sm:$0xff]  ;;  %v1800_v51 = vld [vmem:[%s2567_s5 + $0x10] sm:$0xff]   ;;  %v301_v55 = vld [vmem:[%s1888_s14 + $0xa8] sm:$0xff] }
  0x21   : > { %v498_v52 = vadd.f32 %v448_v49, %v398_v47  ;;  %v350_v56 = vld [vmem:[%s2563_s1 + $0xa0] sm:$0xff]  ;;  %v351_v57 = vld [vmem:[%s2563_s1 + $0xa8] sm:$0xff]  ;;  %v302_v4 = vld [vmem:[%s1888_s14 + $0xb0] sm:$0xff] }
  0x22   : > { %v497_v40 = vadd.f32 %v447_v38, %v397_v36  ;;  %v1801_v58 = vld [vmem:[%s2567_s5 + $0x8] sm:$0xff]   ;;  %v400_v60 = vmul.f32 %v350_v56, %v300_v54  ;;  %v401_v61 = vmul.f32 %v351_v57, %v301_v55  ;;  %v450_v62 = vld [vmem:[%s2564_s2 + $0xa0] sm:$0xff]  ;;  %v303_v5 = vld [vmem:[%s1888_s14 + $0xb8] sm:$0xff] }
  0x23   : > { %v451_v63 = vld [vmem:[%s2564_s2 + $0xa8] sm:$0xff]  ;;  %v1802_v0 = vld [vmem:[%s2567_s5] sm:$0xff]   ;;  %v352_v6 = vld [vmem:[%s2563_s1 + $0xb0] sm:$0xff] }
  0x24   : > { %v538_v46 = vpack.c.bf16 %v497_v40, %v496_v39  ;;  %v500_v2 = vadd.f32 %v450_v62, %v400_v60  ;;  %v353_v7 = vld [vmem:[%s2563_s1 + $0xb8] sm:$0xff]  ;;  %v402_v9 = vmul.f32 %v352_v6, %v302_v4  ;;  %v452_v11 = vld [vmem:[%s2564_s2 + $0xb0] sm:$0xff]  ;;  %v304_v15 = vld [vmem:[%s1888_s14 + $0xc0] sm:$0xff] }
  0x25   : > { %v403_v10 = vmul.f32 %v353_v7, %v303_v5  ;;  %v305_v16 = vld [vmem:[%s1888_s14 + $0xc8] sm:$0xff]  ;;  %v354_v17 = vld [vmem:[%s2563_s1 + $0xc0] sm:$0xff]  ;;  %v306_v26 = vld [vmem:[%s1888_s14 + $0xd0] sm:$0xff] }
  0x26   : > { %v502_v13 = vadd.f32 %v452_v11, %v402_v9  ;;  %v355_v18 = vld [vmem:[%s2563_s1 + $0xc8] sm:$0xff]  ;;  %v404_v20 = vmul.f32 %v354_v17, %v304_v15  ;;  %v454_v22 = vld [vmem:[%s2564_s2 + $0xc0] sm:$0xff]  ;;  %v307_v27 = vld [vmem:[%s1888_s14 + $0xd8] sm:$0xff] }
  0x27   : > { %1588 = vmatmul.mubr.msk.bf16.gmra.mxu0 %vm563_vm3, %v532_v42  ;;  %v1799_v42 = vld [vmem:[%s2567_s5 + $0x18] sm:$0xff]   ;;  %v405_v21 = vmul.f32 %v355_v18, %v305_v16  ;;  %v356_v28 = vld [vmem:[%s2563_s1 + $0xd0] sm:$0xff]  ;;  %v308_v37 = vld [vmem:[%s1888_s14 + $0xe0] sm:$0xff] }
  0x28   : > { %1591 = vmatprep.mubr.msk.bf16.mxu0 %vm1813_vm2, %v1811_v1  ;;  %1680 = vmatpush3.bf16.msra.mxu1 %v1799_v42  ;;  %v504_v24 = vadd.f32 %v454_v22, %v404_v20  ;;  %v357_v29 = vld [vmem:[%s2563_s1 + $0xd8] sm:$0xff]  ;;  %v406_v31 = vmul.f32 %v356_v28, %v306_v26  ;;  %v456_v33 = vld [vmem:[%s2564_s2 + $0xd0] sm:$0xff]  ;;  %v309_v38 = vld [vmem:[%s1888_s14 + $0xe8] sm:$0xff] }
  0x29   : > { %1681 = vmatprep.subr.bf16.mxu1 %v1811_v1  ;;  %v407_v32 = vmul.f32 %v357_v29, %v307_v27  ;;  %v358_v39 = vld [vmem:[%s2563_s1 + $0xe0] sm:$0xff]  ;;  %v359_v40 = vld [vmem:[%s2563_s1 + $0xe8] sm:$0xff]  ;;  %v311_v49 = vld [vmem:[%s1888_s14 + $0xf8] sm:$0xff] }
  0x2a   : > { %v506_v35 = vadd.f32 %v456_v33, %v406_v31  ;;  %v408_v42 = vmul.f32 %v358_v39, %v308_v37  ;;  %v409_v43 = vmul.f32 %v359_v40, %v309_v38  ;;  %v458_v44 = vld [vmem:[%s2564_s2 + $0xe0] sm:$0xff]  ;;  %v459_v45 = vld [vmem:[%s2564_s2 + $0xe8] sm:$0xff]  ;;  %v460_v55 = vld [vmem:[%s2564_s2 + $0xf0] sm:$0xff] }
  0x2b   : > { %v461_v56 = vld [vmem:[%s2564_s2 + $0xf8] sm:$0xff]  ;;  %v313_v60 = vld [vmem:[%s1888_s14 + $0x108] sm:$0xff]  ;;  %v314_v7 = vld [vmem:[%s1888_s14 + $0x110] sm:$0xff] }
  0x2c   : > { %1682 = vmatpush3.bf16.msra.mxu1 %v1800_v51  ;;  %v509_v47 = vadd.f32 %v459_v45, %v409_v43  ;;  %v361_v51 = vld [vmem:[%s2563_s1 + $0xf8] sm:$0xff]  ;;  %v363_v62 = vld [vmem:[%s2563_s1 + $0x108] sm:$0xff]  ;;  %v364_v9 = vld [vmem:[%s2563_s1 + $0x110] sm:$0xff] }
  0x2d   : > { %1683 = vmatprep.subr.bf16.mxu1 %v1811_v1  ;;  %v411_v54 = vmul.f32 %v361_v51, %v311_v49  ;;  %v463_v4 = vld [vmem:[%s2564_s2 + $0x108] sm:$0xff]  ;;  %v465_v15 = vld [vmem:[%s2564_s2 + $0x118] sm:$0xff]  ;;  %v316_v18 = vld [vmem:[%s1888_s14 + $0x120] sm:$0xff] }
  0x2e   : > { %v366_v20 = vld [vmem:[%s2563_s1 + $0x120] sm:$0xff]  ;;  %v467_v26 = vld [vmem:[%s2564_s2 + $0x128] sm:$0xff]  ;;  %v318_v29 = vld [vmem:[%s1888_s14 + $0x130] sm:$0xff] }
  0x2f   : > { %1592 = vmatmul.mubr.msk.bf16.gmra.mxu0 %vm563_vm3, %v533_v53  ;;  %v499_v53 = vadd.f32 %v449_v50, %v399_v48  ;;  %v310_v48 = vld [vmem:[%s1888_s14 + $0xf0] sm:$0xff]  ;;  %v469_v37 = vld [vmem:[%s2564_s2 + $0x138] sm:$0xff]  ;;  %v320_v40 = vld [vmem:[%s1888_s14 + $0x140] sm:$0xff] }
  0x30   : > { %1595 = vmatprep.mubr.msk.bf16.mxu0 %vm1813_vm2, %v1811_v1  ;;  %1684 = vmatpush3.bf16.msra.mxu1 %v1801_v58  ;;  %v360_v50 = vld [vmem:[%s2563_s1 + $0xf0] sm:$0xff]  ;;  %v511_v58 = vadd.f32 %v461_v56, %v411_v54  ;;  %v371_v43 = vld [vmem:[%s2563_s1 + $0x148] sm:$0xff]  ;;  %v373_v54 = vld [vmem:[%s2563_s1 + $0x158] sm:$0xff] }
  0x31   : > { %v539_v59 = vpack.c.bf16 %v499_v53, %v498_v52  ;;  %1685 = vmatprep.subr.bf16.mxu1 %v1811_v1  ;;  %v410_v53 = vmul.f32 %v360_v50, %v310_v48  ;;  %v368_v31 = vld [vmem:[%s2563_s1 + $0x130] sm:$0xff]  ;;  %v471_v48 = vld [vmem:[%s2564_s2 + $0x148] sm:$0xff] }
  0x32   : > { %v322_v51 = vld [vmem:[%s1888_s14 + $0x150] sm:$0xff] }
  0x33   : > { %v510_v57 = vadd.f32 %v460_v55, %v410_v53  ;;  %v372_v53 = vld [vmem:[%s2563_s1 + $0x150] sm:$0xff] }
  0x34   : > { %1686 = vmatpush3.bf16.msra.mxu1 %v1802_v0  ;;  %v422_v56 = vmul.f32 %v372_v53, %v322_v51 }
  0x37   : > { %1596 = vmatmul.mubr.msk.bf16.gmra.mxu0 %vm563_vm3, %v534_v3  ;;  %v501_v3 = vadd.f32 %v451_v63, %v401_v61  ;;  %v362_v61 = vld [vmem:[%s2563_s1 + $0x100] sm:$0xff]  ;;  %v545_v63 = vpack.c.bf16 %v511_v58, %v510_v57  ;;  %v472_v58 = vld [vmem:[%s2564_s2 + $0x150] sm:$0xff] }
  0x38   : > { %1599 = vmatprep.mubr.msk.bf16.mxu0 %vm1813_vm2, %v1811_v1 }
  0x39   : > { %v540_v8 = vpack.c.bf16 %v501_v3, %v500_v2  ;;  %v413_v2 = vmul.f32 %v363_v62, %v313_v60  ;;  %v462_v3 = vld [vmem:[%s2564_s2 + $0x100] sm:$0xff]  ;;  %v522_v60 = vadd.f32 %v472_v58, %v422_v56 }
  0x3a   : > { %v324_v62 = vld [vmem:[%s1888_s14 + $0x160] sm:$0xff] }
  0x3b   : > { %v513_v6 = vadd.f32 %v463_v4, %v413_v2  ;;  %v375_v2 = vld [vmem:[%s2563_s1 + $0x168] sm:$0xff] }
  0x3f   : > { %1600 = vmatmul.mubr.msk.bf16.gmra.mxu0 %vm563_vm3, %v535_v12  ;;  %v453_v12 = vld [vmem:[%s2564_s2 + $0xb8] sm:$0xff] }
  0x40   : > { %1603 = vmatprep.mubr.msk.bf16.mxu0 %vm1813_vm2, %v1811_v1  ;;  %v503_v14 = vadd.f32 %v453_v12, %v403_v10  ;;  %v365_v10 = vld [vmem:[%s2563_s1 + $0x118] sm:$0xff]  ;;  %v414_v12 = vmul.f32 %v364_v9, %v314_v7  ;;  %v475_v7 = vld [vmem:[%s2564_s2 + $0x168] sm:$0xff] }
  0x42   : > { %v541_v19 = vpack.c.bf16 %v503_v14, %v502_v13  ;;  %v464_v14 = vld [vmem:[%s2564_s2 + $0x110] sm:$0xff] }
  0x43   : > { %v514_v16 = vadd.f32 %v464_v14, %v414_v12  ;;  %v376_v12 = vld [vmem:[%s2563_s1 + $0x170] sm:$0xff] }
  0x47   : > { %1604 = vmatmul.mubr.msk.bf16.gmra.mxu0 %vm563_vm3, %v536_v23  ;;  %v455_v23 = vld [vmem:[%s2564_s2 + $0xc8] sm:$0xff] }
  0x48   : > { %1607 = vmatprep.mubr.msk.bf16.mxu0 %vm1813_vm2, %v1811_v1  ;;  %v505_v25 = vadd.f32 %v455_v23, %v405_v21  ;;  %v367_v21 = vld [vmem:[%s2563_s1 + $0x128] sm:$0xff]  ;;  %v416_v23 = vmul.f32 %v366_v20, %v316_v18  ;;  %v477_v18 = vld [vmem:[%s2564_s2 + $0x178] sm:$0xff] }
  0x4a   : > { %v542_v30 = vpack.c.bf16 %v505_v25, %v504_v24  ;;  %v466_v25 = vld [vmem:[%s2564_s2 + $0x120] sm:$0xff] }
  0x4b   : > { %v516_v27 = vadd.f32 %v466_v25, %v416_v23  ;;  %v378_v23 = vld [vmem:[%s2563_s1 + $0x180] sm:$0xff] }
  0x4f   : > { %1608 = vmatmul.mubr.msk.bf16.gmra.mxu0 %vm563_vm3, %v537_v34  ;;  %v457_v34 = vld [vmem:[%s2564_s2 + $0xd8] sm:$0xff] }
  0x50   : > { %1611 = vmatprep.mubr.msk.bf16.mxu0 %vm1813_vm2, %v1811_v1  ;;  %v507_v36 = vadd.f32 %v457_v34, %v407_v32  ;;  %v369_v32 = vld [vmem:[%s2563_s1 + $0x138] sm:$0xff]  ;;  %v418_v34 = vmul.f32 %v368_v31, %v318_v29  ;;  %v479_v29 = vld [vmem:[%s2564_s2 + $0x188] sm:$0xff] }
  0x52   : > { %v543_v41 = vpack.c.bf16 %v507_v36, %v506_v35  ;;  %v468_v36 = vld [vmem:[%s2564_s2 + $0x130] sm:$0xff] }
  0x53   : > { %v518_v38 = vadd.f32 %v468_v36, %v418_v34 }
  0x57   : > { %1612 = vmatmul.mubr.msk.bf16.gmra.mxu0 %vm563_vm3, %v538_v46  ;;  %v508_v46 = vadd.f32 %v458_v44, %v408_v42  ;;  %v370_v42 = vld [vmem:[%s2563_s1 + $0x140] sm:$0xff] }
  0x58   : > { %1615 = vmatprep.mubr.msk.bf16.mxu0 %vm1813_vm2, %v1811_v1  ;;  %v420_v45 = vmul.f32 %v370_v42, %v320_v40 }
  0x59   : > { %v544_v52 = vpack.c.bf16 %v509_v47, %v508_v46  ;;  %v470_v47 = vld [vmem:[%s2564_s2 + $0x140] sm:$0xff] }
  0x5a   : > { %v520_v49 = vadd.f32 %v470_v47, %v420_v45 }
  0x5f   : > { %1616 = vmatmul.mubr.msk.bf16.gmra.mxu0 %vm563_vm3, %v539_v59  ;;  %v312_v59 = vld [vmem:[%s1888_s14 + $0x100] sm:$0xff] }
  0x60   : > { %1619 = vmatprep.mubr.msk.bf16.mxu0 %vm1813_vm2, %v1811_v1  ;;  %v412_v0 = vmul.f32 %v362_v61, %v312_v59  ;;  %v473_v59 = vld [vmem:[%s2564_s2 + $0x158] sm:$0xff] }
  0x62   : > { %v512_v5 = vadd.f32 %v462_v3, %v412_v0  ;;  %v374_v0 = vld [vmem:[%s2563_s1 + $0x160] sm:$0xff] }
  0x63   : > { %v424_v4 = vmul.f32 %v374_v0, %v324_v62 }
  0x64   : > { %v546_v11 = vpack.c.bf16 %v513_v6, %v512_v5  ;;  %v474_v6 = vld [vmem:[%s2564_s2 + $0x160] sm:$0xff] }
  0x67   : > { %1620 = vmatmul.mubr.msk.bf16.gmra.mxu0 %vm563_vm3, %v540_v8  ;;  %v315_v8 = vld [vmem:[%s1888_s14 + $0x118] sm:$0xff] }
  0x68   : > { %1623 = vmatprep.mubr.msk.bf16.mxu0 %vm1813_vm2, %v1811_v1  ;;  %v415_v13 = vmul.f32 %v365_v10, %v315_v8  ;;  %v524_v8 = vadd.f32 %v474_v6, %v424_v4  ;;  %v326_v10 = vld [vmem:[%s1888_s14 + $0x170] sm:$0xff] }
  0x6a   : > { %v515_v17 = vadd.f32 %v465_v15, %v415_v13  ;;  %v377_v13 = vld [vmem:[%s2563_s1 + $0x178] sm:$0xff]  ;;  %v426_v15 = vmul.f32 %v376_v12, %v326_v10 }
  0x6c   : > { %v547_v22 = vpack.c.bf16 %v515_v17, %v514_v16  ;;  %v476_v17 = vld [vmem:[%s2564_s2 + $0x170] sm:$0xff] }
  0x6f   : > { %1624 = vmatmul.mubr.msk.bf16.gmra.mxu0 %vm563_vm3, %v541_v19  ;;  %v317_v19 = vld [vmem:[%s1888_s14 + $0x128] sm:$0xff] }
  0x70   : > { %1627 = vmatprep.mubr.msk.bf16.mxu0 %vm1813_vm2, %v1811_v1  ;;  %v417_v24 = vmul.f32 %v367_v21, %v317_v19  ;;  %v526_v19 = vadd.f32 %v476_v17, %v426_v15  ;;  %v328_v21 = vld [vmem:[%s1888_s14 + $0x180] sm:$0xff] }
  0x72   : > { %v517_v28 = vadd.f32 %v467_v26, %v417_v24  ;;  %v379_v24 = vld [vmem:[%s2563_s1 + $0x188] sm:$0xff]  ;;  %v428_v26 = vmul.f32 %v378_v23, %v328_v21 }
  0x74   : > { %v548_v33 = vpack.c.bf16 %v517_v28, %v516_v27  ;;  %v478_v28 = vld [vmem:[%s2564_s2 + $0x180] sm:$0xff] }
  0x77   : > { %1628 = vmatmul.mubr.msk.bf16.gmra.mxu0 %vm563_vm3, %v542_v30  ;;  %v319_v30 = vld [vmem:[%s1888_s14 + $0x138] sm:$0xff] }
  0x78   : > { %1631 = vmatprep.mubr.msk.bf16.mxu0 %vm1813_vm2, %v1811_v1  ;;  %v419_v35 = vmul.f32 %v369_v32, %v319_v30  ;;  %v528_v30 = vadd.f32 %v478_v28, %v428_v26 }
  0x7a   : > { %v519_v39 = vadd.f32 %v469_v37, %v419_v35 }
  0x7c   : > { %v549_v44 = vpack.c.bf16 %v519_v39, %v518_v38 }
  0x7f   : > { %1632 = vmatmul.mubr.msk.bf16.gmra.mxu0 %vm563_vm3, %v543_v41  ;;  %v321_v41 = vld [vmem:[%s1888_s14 + $0x148] sm:$0xff] }
  0x80   : > { %1635 = vmatprep.mubr.msk.bf16.mxu0 %vm1813_vm2, %v1811_v1  ;;  %v421_v46 = vmul.f32 %v371_v43, %v321_v41 }
  0x82   : > { %v521_v50 = vadd.f32 %v471_v48, %v421_v46 }
  0x84   : > { %v550_v55 = vpack.c.bf16 %v521_v50, %v520_v49 }
  0x87   : > { %1636 = vmatmul.mubr.msk.bf16.gmra.mxu0 %vm563_vm3, %v544_v52  ;;  %v323_v52 = vld [vmem:[%s1888_s14 + $0x158] sm:$0xff] }
  0x88   : > { %1639 = vmatprep.mubr.msk.bf16.mxu0 %vm1813_vm2, %v1811_v1  ;;  %v423_v57 = vmul.f32 %v373_v54, %v323_v52 }
  0x8a   : > { %v523_v61 = vadd.f32 %v473_v59, %v423_v57 }
  0x8c   : > { %v551_v3 = vpack.c.bf16 %v523_v61, %v522_v60 }
  0x8f   : > { %1640 = vmatmul.mubr.msk.bf16.gmra.mxu0 %vm563_vm3, %v545_v63  ;;  %v325_v63 = vld [vmem:[%s1888_s14 + $0x168] sm:$0xff] }
  0x90   : > { %1643 = vmatprep.mubr.msk.bf16.mxu0 %vm1813_vm2, %v1811_v1  ;;  %v425_v5 = vmul.f32 %v375_v2, %v325_v63 }
  0x92   : > { %v525_v9 = vadd.f32 %v475_v7, %v425_v5 }
  0x94   : > { %v552_v14 = vpack.c.bf16 %v525_v9, %v524_v8 }
  0x97   : > { %1644 = vmatmul.mubr.msk.bf16.gmra.mxu0 %vm563_vm3, %v546_v11  ;;  %v327_v11 = vld [vmem:[%s1888_s14 + $0x178] sm:$0xff] }
  0x98   : > { %1647 = vmatprep.mubr.msk.bf16.mxu0 %vm1813_vm2, %v1811_v1  ;;  %v427_v16 = vmul.f32 %v377_v13, %v327_v11 }
  0x9a   : > { %v527_v20 = vadd.f32 %v477_v18, %v427_v16 }
  0x9c   : > { %v553_v25 = vpack.c.bf16 %v527_v20, %v526_v19 }
  0x9f   : > { %1648 = vmatmul.mubr.msk.bf16.gmra.mxu0 %vm563_vm3, %v547_v22  ;;  %v329_v22 = vld [vmem:[%s1888_s14 + $0x188] sm:$0xff] }
  0xa0   : > { %1651 = vmatprep.mubr.msk.bf16.mxu0 %vm1813_vm2, %v1811_v1  ;;  %v429_v27 = vmul.f32 %v379_v24, %v329_v22 }
  0xa2   : > { %v529_v31 = vadd.f32 %v479_v29, %v429_v27 }
  0xa4   : > { %v554_v32 = vpack.c.bf16 %v529_v31, %v528_v30 }
  0xa7   : > { %1652 = vmatmul.mubr.msk.bf16.gmra.mxu0 %vm563_vm3, %v548_v33  ;;  %v2321_v33 = vld [vmem:[%s2566_s4] ss:$0 sm:$0xff] }
  0xa8   : > { %1655 = vmatprep.mubr.msk.bf16.mxu0 %vm1813_vm2, %v1811_v1 }
  0xaf   : > { %1656 = vmatmul.mubr.msk.bf16.gmra.mxu0 %vm563_vm3, %v549_v44 }
  0xb0   : > { %1659 = vmatprep.mubr.msk.bf16.mxu0 %vm1813_vm2, %v1811_v1 }
  0xb7   : > { %1660 = vmatmul.mubr.msk.bf16.gmra.mxu0 %vm563_vm3, %v550_v55 }
  0xb8   : > { %1663 = vmatprep.mubr.msk.bf16.mxu0 %vm1813_vm2, %v1811_v1 }
  0xbf   : > { %1664 = vmatmul.mubr.msk.bf16.gmra.mxu0 %vm563_vm3, %v551_v3 }
  0xc0   : > { %1667 = vmatprep.mubr.msk.bf16.mxu0 %vm1813_vm2, %v1811_v1 }
  0xc7   : > { %1668 = vmatmul.mubr.msk.bf16.gmra.mxu0 %vm563_vm3, %v552_v14 }
  0xc8   : > { %1671 = vmatprep.mubr.msk.bf16.mxu0 %vm1813_vm2, %v1811_v1 }
  0xcf   : > { %1672 = vmatmul.mubr.msk.bf16.gmra.mxu0 %vm563_vm3, %v553_v25 }
  0xd0   : > { %1675 = vmatprep.mubr.msk.bf16.mxu0 %vm1813_vm2, %v1811_v1 }
  0xd7   : > { %v680_v34 = vpop.f32.mrf.mxu0  ;;  %1676 = vmatmul.mubr.msk.bf16.gmra.mxu0 %vm563_vm3, %v554_v32 }
  0xd8   : > { %v681_v36 = vadd.f32 %v2321_v33, %v680_v34 }
  0xd9   : > { %v1581_v35 = vpop.f32.mrf.mxu0 }
  0xda   : > { %v879_v40 = vmax.f32 %v681_v36, 0.0 }
  0xdb   : > { %v683_v37 = vpop.f32.mrf.mxu0 }
  0xdc   : > { %v684_v38 = vadd.f32 %v2321_v33, %v683_v37 }
  0xdd   : > { %v1582_v39 = vpop.f32.mrf.mxu0 }
  0xde   : > { %v880_v41 = vmax.f32 %v684_v38, 0.0 }
  0xdf   : > { %v688_v42 = vpop.f32.mrf.mxu0 }
  0xe0   : > { %v929_v43 = vpack.c.bf16 %v880_v41, %v879_v40  ;;  %v689_v45 = vadd.f32 %v2321_v33, %v688_v42 }
  0xe1   : > { %v1585_v44 = vpop.f32.mrf.mxu0 }
  0xe2   : > { %1688 = vmatmul.mubr.msk.bf16.vlgmr.msra.gmra.mxu1 %vm993_vm4, %v929_v43  ;;  %v881_v49 = vmax.f32 %v689_v45, 0.0 }
  0xe3   : > { %v691_v46 = vpop.f32.mrf.mxu0  ;;  %1691 = vmatprep.mubr.msk.bf16.mxu1 %vm1813_vm2, %v1811_v1 }
  0xe4   : > { %v692_v47 = vadd.f32 %v2321_v33, %v691_v46 }
  0xe5   : > { %v1586_v48 = vpop.f32.mrf.mxu0 }
  0xe6   : > { %v882_v50 = vmax.f32 %v692_v47, 0.0 }
  0xe7   : > { %v696_v51 = vpop.f32.mrf.mxu0 }
  0xe8   : > { %v930_v52 = vpack.c.bf16 %v882_v50, %v881_v49  ;;  %v697_v54 = vadd.f32 %v2321_v33, %v696_v51 }
  0xe9   : > { %v1589_v53 = vpop.f32.mrf.mxu0 }
  0xea   : > { %1692 = vmatmul.mubr.msk.bf16.gmra.mxu1 %vm993_vm4, %v930_v52  ;;  %v883_v58 = vmax.f32 %v697_v54, 0.0 }
  0xeb   : > { %v699_v55 = vpop.f32.mrf.mxu0  ;;  %1695 = vmatprep.mubr.msk.bf16.mxu1 %vm1813_vm2, %v1811_v1 }
  0xec   : > { %v700_v56 = vadd.f32 %v2321_v33, %v699_v55 }
  0xed   : > { %v1590_v57 = vpop.f32.mrf.mxu0 }
  0xee   : > { %v884_v59 = vmax.f32 %v700_v56, 0.0 }
  0xef   : > { %v704_v60 = vpop.f32.mrf.mxu0 }
  0xf0   : > { %v931_v61 = vpack.c.bf16 %v884_v59, %v883_v58  ;;  %v705_v63 = vadd.f32 %v2321_v33, %v704_v60 }
  0xf1   : > { %v1593_v62 = vpop.f32.mrf.mxu0 }
  0xf2   : > { %1696 = vmatmul.mubr.msk.bf16.gmra.mxu1 %vm993_vm4, %v931_v61  ;;  %v885_v4 = vmax.f32 %v705_v63, 0.0 }
  0xf3   : > { %v707_v0 = vpop.f32.mrf.mxu0  ;;  %1699 = vmatprep.mubr.msk.bf16.mxu1 %vm1813_vm2, %v1811_v1 }
  0xf4   : > { %v708_v2 = vadd.f32 %v2321_v33, %v707_v0 }
  0xf5   : > { %v1594_v3 = vpop.f32.mrf.mxu0 }
  0xf6   : > { %v886_v5 = vmax.f32 %v708_v2, 0.0 }
  0xf7   : > { %v712_v6 = vpop.f32.mrf.mxu0 }
  0xf8   : > { %v932_v7 = vpack.c.bf16 %v886_v5, %v885_v4  ;;  %v713_v9 = vadd.f32 %v2321_v33, %v712_v6 }
  0xf9   : > { %v1597_v8 = vpop.f32.mrf.mxu0 }
  0xfa   : > { %1700 = vmatmul.mubr.msk.bf16.gmra.mxu1 %vm993_vm4, %v932_v7  ;;  %v887_v13 = vmax.f32 %v713_v9, 0.0 }
  0xfb   : > { %v715_v10 = vpop.f32.mrf.mxu0  ;;  %1703 = vmatprep.mubr.msk.bf16.mxu1 %vm1813_vm2, %v1811_v1 }
  0xfc   : > { %v716_v11 = vadd.f32 %v2321_v33, %v715_v10 }
  0xfd   : > { %v1598_v12 = vpop.f32.mrf.mxu0 }
  0xfe   : > { %v888_v14 = vmax.f32 %v716_v11, 0.0 }
  0xff   : > { %v720_v15 = vpop.f32.mrf.mxu0 }
 0x100   : > { %v933_v16 = vpack.c.bf16 %v888_v14, %v887_v13  ;;  %v721_v18 = vadd.f32 %v2321_v33, %v720_v15 }
 0x101   : > { %v1601_v17 = vpop.f32.mrf.mxu0 }
 0x102   : > { %1704 = vmatmul.mubr.msk.bf16.gmra.mxu1 %vm993_vm4, %v933_v16  ;;  %v889_v22 = vmax.f32 %v721_v18, 0.0 }
 0x103   : > { %v723_v19 = vpop.f32.mrf.mxu0  ;;  %1707 = vmatprep.mubr.msk.bf16.mxu1 %vm1813_vm2, %v1811_v1 }
 0x104   : > { %v724_v20 = vadd.f32 %v2321_v33, %v723_v19 }
 0x105   : > { %v1602_v21 = vpop.f32.mrf.mxu0 }
 0x106   : > { %v890_v23 = vmax.f32 %v724_v20, 0.0 }
 0x107   : > { %v728_v24 = vpop.f32.mrf.mxu0 }
 0x108   : > { %v934_v25 = vpack.c.bf16 %v890_v23, %v889_v22  ;;  %v729_v27 = vadd.f32 %v2321_v33, %v728_v24 }
 0x109   : > { %v1605_v26 = vpop.f32.mrf.mxu0 }
 0x10a   : > { %1708 = vmatmul.mubr.msk.bf16.gmra.mxu1 %vm993_vm4, %v934_v25  ;;  %v891_v31 = vmax.f32 %v729_v27, 0.0 }
 0x10b   : > { %v731_v28 = vpop.f32.mrf.mxu0  ;;  %1711 = vmatprep.mubr.msk.bf16.mxu1 %vm1813_vm2, %v1811_v1 }
 0x10c   : > { %v732_v29 = vadd.f32 %v2321_v33, %v731_v28 }
 0x10d   : > { %v1606_v30 = vpop.f32.mrf.mxu0 }
 0x10e   : > { %v892_v32 = vmax.f32 %v732_v29, 0.0 }
 0x10f   : > { %v736_v34 = vpop.f32.mrf.mxu0 }
 0x110   : > { %v935_v35 = vpack.c.bf16 %v892_v32, %v891_v31  ;;  %v737_v37 = vadd.f32 %v2321_v33, %v736_v34 }
 0x111   : > { %v1609_v36 = vpop.f32.mrf.mxu0 }
 0x112   : > { %1712 = vmatmul.mubr.msk.bf16.gmra.mxu1 %vm993_vm4, %v935_v35  ;;  %v893_v41 = vmax.f32 %v737_v37, 0.0 }
 0x113   : > { %v739_v38 = vpop.f32.mrf.mxu0  ;;  %1715 = vmatprep.mubr.msk.bf16.mxu1 %vm1813_vm2, %v1811_v1 }
 0x114   : > { %v740_v39 = vadd.f32 %v2321_v33, %v739_v38 }
 0x115   : > { %v1610_v40 = vpop.f32.mrf.mxu0 }
 0x116   : > { %v894_v42 = vmax.f32 %v740_v39, 0.0 }
 0x117   : > { %v744_v43 = vpop.f32.mrf.mxu0 }
 0x118   : > { %v936_v44 = vpack.c.bf16 %v894_v42, %v893_v41  ;;  %v745_v46 = vadd.f32 %v2321_v33, %v744_v43 }
 0x119   : > { %v1613_v45 = vpop.f32.mrf.mxu0 }
 0x11a   : > { %1716 = vmatmul.mubr.msk.bf16.gmra.mxu1 %vm993_vm4, %v936_v44  ;;  %v895_v50 = vmax.f32 %v745_v46, 0.0 }
 0x11b   : > { %v747_v47 = vpop.f32.mrf.mxu0  ;;  %1719 = vmatprep.mubr.msk.bf16.mxu1 %vm1813_vm2, %v1811_v1 }
 0x11c   : > { %v748_v48 = vadd.f32 %v2321_v33, %v747_v47 }
 0x11d   : > { %v1614_v49 = vpop.f32.mrf.mxu0 }
 0x11e   : > { %v896_v51 = vmax.f32 %v748_v48, 0.0 }
 0x11f   : > { %v752_v52 = vpop.f32.mrf.mxu0 }
 0x120   : > { %v937_v53 = vpack.c.bf16 %v896_v51, %v895_v50  ;;  %v753_v55 = vadd.f32 %v2321_v33, %v752_v52 }
 0x121   : > { %v1617_v54 = vpop.f32.mrf.mxu0 }
 0x122   : > { %1720 = vmatmul.mubr.msk.bf16.gmra.mxu1 %vm993_vm4, %v937_v53  ;;  %v897_v59 = vmax.f32 %v753_v55, 0.0 }
 0x123   : > { %v755_v56 = vpop.f32.mrf.mxu0  ;;  %1723 = vmatprep.mubr.msk.bf16.mxu1 %vm1813_vm2, %v1811_v1 }
 0x124   : > { %v756_v57 = vadd.f32 %v2321_v33, %v755_v56 }
 0x125   : > { %v1618_v58 = vpop.f32.mrf.mxu0 }
 0x126   : > { %v898_v60 = vmax.f32 %v756_v57, 0.0 }
 0x127   : > { %v760_v61 = vpop.f32.mrf.mxu0 }
 0x128   : > { %v938_v62 = vpack.c.bf16 %v898_v60, %v897_v59  ;;  %v761_v0 = vadd.f32 %v2321_v33, %v760_v61 }
 0x129   : > { %v1621_v63 = vpop.f32.mrf.mxu0 }
 0x12a   : > { %1724 = vmatmul.mubr.msk.bf16.gmra.mxu1 %vm993_vm4, %v938_v62  ;;  %v899_v5 = vmax.f32 %v761_v0, 0.0 }
 0x12b   : > { %v763_v2 = vpop.f32.mrf.mxu0  ;;  %1727 = vmatprep.mubr.msk.bf16.mxu1 %vm1813_vm2, %v1811_v1 }
 0x12c   : > { %v764_v3 = vadd.f32 %v2321_v33, %v763_v2 }
 0x12d   : > { %v1622_v4 = vpop.f32.mrf.mxu0 }
 0x12e   : > { %v900_v6 = vmax.f32 %v764_v3, 0.0 }
 0x12f   : > { %v768_v7 = vpop.f32.mrf.mxu0 }
 0x130   : > { %v939_v8 = vpack.c.bf16 %v900_v6, %v899_v5  ;;  %v769_v10 = vadd.f32 %v2321_v33, %v768_v7 }
 0x131   : > { %v1625_v9 = vpop.f32.mrf.mxu0 }
 0x132   : > { %1728 = vmatmul.mubr.msk.bf16.gmra.mxu1 %vm993_vm4, %v939_v8  ;;  %v901_v14 = vmax.f32 %v769_v10, 0.0 }
 0x133   : > { %v771_v11 = vpop.f32.mrf.mxu0  ;;  %1731 = vmatprep.mubr.msk.bf16.mxu1 %vm1813_vm2, %v1811_v1 }
 0x134   : > { %v772_v12 = vadd.f32 %v2321_v33, %v771_v11 }
 0x135   : > { %v1626_v13 = vpop.f32.mrf.mxu0 }
 0x136   : > { %v902_v15 = vmax.f32 %v772_v12, 0.0 }
 0x137   : > { %v776_v16 = vpop.f32.mrf.mxu0 }
 0x138   : > { %v940_v17 = vpack.c.bf16 %v902_v15, %v901_v14  ;;  %v777_v19 = vadd.f32 %v2321_v33, %v776_v16 }
 0x139   : > { %v1629_v18 = vpop.f32.mrf.mxu0 }
 0x13a   : > { %1732 = vmatmul.mubr.msk.bf16.gmra.mxu1 %vm993_vm4, %v940_v17  ;;  %v903_v23 = vmax.f32 %v777_v19, 0.0 }
 0x13b   : > { %v779_v20 = vpop.f32.mrf.mxu0  ;;  %1735 = vmatprep.mubr.msk.bf16.mxu1 %vm1813_vm2, %v1811_v1 }
 0x13c   : > { %v780_v21 = vadd.f32 %v2321_v33, %v779_v20 }
 0x13d   : > { %v1630_v22 = vpop.f32.mrf.mxu0 }
 0x13e   : > { %v904_v24 = vmax.f32 %v780_v21, 0.0 }
 0x13f   : > { %v784_v25 = vpop.f32.mrf.mxu0 }
 0x140   : > { %v941_v26 = vpack.c.bf16 %v904_v24, %v903_v23  ;;  %v785_v28 = vadd.f32 %v2321_v33, %v784_v25 }
 0x141   : > { %v1633_v27 = vpop.f32.mrf.mxu0 }
 0x142   : > { %1736 = vmatmul.mubr.msk.bf16.gmra.mxu1 %vm993_vm4, %v941_v26  ;;  %v905_v32 = vmax.f32 %v785_v28, 0.0 }
 0x143   : > { %v787_v29 = vpop.f32.mrf.mxu0  ;;  %1739 = vmatprep.mubr.msk.bf16.mxu1 %vm1813_vm2, %v1811_v1 }
 0x144   : > { %v788_v30 = vadd.f32 %v2321_v33, %v787_v29 }
 0x145   : > { %v1634_v31 = vpop.f32.mrf.mxu0 }
 0x146   : > { %v906_v34 = vmax.f32 %v788_v30, 0.0 }
 0x147   : > { %v792_v35 = vpop.f32.mrf.mxu0 }
 0x148   : > { %v942_v36 = vpack.c.bf16 %v906_v34, %v905_v32  ;;  %v793_v38 = vadd.f32 %v2321_v33, %v792_v35 }
 0x149   : > { %v1637_v37 = vpop.f32.mrf.mxu0 }
 0x14a   : > { %1740 = vmatmul.mubr.msk.bf16.gmra.mxu1 %vm993_vm4, %v942_v36  ;;  %v907_v42 = vmax.f32 %v793_v38, 0.0 }
 0x14b   : > { %v795_v39 = vpop.f32.mrf.mxu0  ;;  %1743 = vmatprep.mubr.msk.bf16.mxu1 %vm1813_vm2, %v1811_v1 }
 0x14c   : > { %v796_v40 = vadd.f32 %v2321_v33, %v795_v39 }
 0x14d   : > { %v1638_v41 = vpop.f32.mrf.mxu0 }
 0x14e   : > { %v908_v43 = vmax.f32 %v796_v40, 0.0 }
 0x14f   : > { %v800_v44 = vpop.f32.mrf.mxu0 }
 0x150   : > { %v943_v45 = vpack.c.bf16 %v908_v43, %v907_v42  ;;  %v801_v47 = vadd.f32 %v2321_v33, %v800_v44 }
 0x151   : > { %v1641_v46 = vpop.f32.mrf.mxu0 }
 0x152   : > { %1744 = vmatmul.mubr.msk.bf16.gmra.mxu1 %vm993_vm4, %v943_v45  ;;  %v909_v51 = vmax.f32 %v801_v47, 0.0 }
 0x153   : > { %v803_v48 = vpop.f32.mrf.mxu0  ;;  %1747 = vmatprep.mubr.msk.bf16.mxu1 %vm1813_vm2, %v1811_v1 }
 0x154   : > { %v804_v49 = vadd.f32 %v2321_v33, %v803_v48 }
 0x155   : > { %v1642_v50 = vpop.f32.mrf.mxu0 }
 0x156   : > { %v910_v52 = vmax.f32 %v804_v49, 0.0 }
 0x157   : > { %v808_v53 = vpop.f32.mrf.mxu0 }
 0x158   : > { %v944_v54 = vpack.c.bf16 %v910_v52, %v909_v51  ;;  %v809_v56 = vadd.f32 %v2321_v33, %v808_v53 }
 0x159   : > { %v1645_v55 = vpop.f32.mrf.mxu0 }
 0x15a   : > { %1748 = vmatmul.mubr.msk.bf16.gmra.mxu1 %vm993_vm4, %v944_v54  ;;  %v911_v60 = vmax.f32 %v809_v56, 0.0 }
 0x15b   : > { %v811_v57 = vpop.f32.mrf.mxu0  ;;  %1751 = vmatprep.mubr.msk.bf16.mxu1 %vm1813_vm2, %v1811_v1 }
 0x15c   : > { %v812_v58 = vadd.f32 %v2321_v33, %v811_v57 }
 0x15d   : > { %v1646_v59 = vpop.f32.mrf.mxu0 }
 0x15e   : > { %v912_v61 = vmax.f32 %v812_v58, 0.0 }
 0x15f   : > { %v816_v62 = vpop.f32.mrf.mxu0 }
 0x160   : > { %v945_v63 = vpack.c.bf16 %v912_v61, %v911_v60  ;;  %v817_v2 = vadd.f32 %v2321_v33, %v816_v62 }
 0x161   : > { %v1649_v0 = vpop.f32.mrf.mxu0 }
 0x162   : > { %1752 = vmatmul.mubr.msk.bf16.gmra.mxu1 %vm993_vm4, %v945_v63  ;;  %v913_v6 = vmax.f32 %v817_v2, 0.0 }
 0x163   : > { %v819_v3 = vpop.f32.mrf.mxu0  ;;  %1755 = vmatprep.mubr.msk.bf16.mxu1 %vm1813_vm2, %v1811_v1 }
 0x164   : > { %v820_v4 = vadd.f32 %v2321_v33, %v819_v3 }
 0x165   : > { %v1650_v5 = vpop.f32.mrf.mxu0 }
 0x166   : > { %v914_v7 = vmax.f32 %v820_v4, 0.0 }
 0x167   : > { %v824_v8 = vpop.f32.mrf.mxu0 }
 0x168   : > { %v946_v9 = vpack.c.bf16 %v914_v7, %v913_v6  ;;  %v825_v11 = vadd.f32 %v2321_v33, %v824_v8 }
 0x169   : > { %v1653_v10 = vpop.f32.mrf.mxu0 }
 0x16a   : > { %1756 = vmatmul.mubr.msk.bf16.gmra.mxu1 %vm993_vm4, %v946_v9  ;;  %v915_v15 = vmax.f32 %v825_v11, 0.0  ;;  %v2449_v10 = vld [vmem:[%s2568_s6] ss:$0 sm:$0xff] }
 0x16b   : > { %v827_v12 = vpop.f32.mrf.mxu0  ;;  %1759 = vmatprep.mubr.msk.bf16.mxu1 %vm1813_vm2, %v1811_v1 }
 0x16c   : > { %v828_v13 = vadd.f32 %v2321_v33, %v827_v12 }
 0x16d   : > { %v1654_v14 = vpop.f32.mrf.mxu0 }
 0x16e   : > { %v916_v16 = vmax.f32 %v828_v13, 0.0 }
 0x16f   : > { %v832_v17 = vpop.f32.mrf.mxu0 }
 0x170   : > { %v947_v18 = vpack.c.bf16 %v916_v16, %v915_v15  ;;  %v833_v20 = vadd.f32 %v2321_v33, %v832_v17 }
 0x171   : > { %v1657_v19 = vpop.f32.mrf.mxu0 }
 0x172   : > { %1760 = vmatmul.mubr.msk.bf16.gmra.mxu1 %vm993_vm4, %v947_v18  ;;  %v917_v24 = vmax.f32 %v833_v20, 0.0 }
 0x173   : > { %v835_v21 = vpop.f32.mrf.mxu0  ;;  %1763 = vmatprep.mubr.msk.bf16.mxu1 %vm1813_vm2, %v1811_v1 }
 0x174   : > { %v836_v22 = vadd.f32 %v2321_v33, %v835_v21 }
 0x175   : > { %v1658_v23 = vpop.f32.mrf.mxu0 }
 0x176   : > { %v918_v25 = vmax.f32 %v836_v22, 0.0 }
 0x177   : > { %v840_v26 = vpop.f32.mrf.mxu0 }
 0x178   : > { %v948_v27 = vpack.c.bf16 %v918_v25, %v917_v24  ;;  %v841_v29 = vadd.f32 %v2321_v33, %v840_v26 }
 0x179   : > { %v1661_v28 = vpop.f32.mrf.mxu0 }
 0x17a   : > { %1764 = vmatmul.mubr.msk.bf16.gmra.mxu1 %vm993_vm4, %v948_v27  ;;  %v919_v34 = vmax.f32 %v841_v29, 0.0 }
 0x17b   : > { %v843_v30 = vpop.f32.mrf.mxu0  ;;  %1767 = vmatprep.mubr.msk.bf16.mxu1 %vm1813_vm2, %v1811_v1 }
 0x17c   : > { %v844_v31 = vadd.f32 %v2321_v33, %v843_v30 }
 0x17d   : > { %v1662_v32 = vpop.f32.mrf.mxu0 }
 0x17e   : > { %v920_v35 = vmax.f32 %v844_v31, 0.0 }
 0x17f   : > { %v848_v36 = vpop.f32.mrf.mxu0 }
 0x180   : > { %v949_v37 = vpack.c.bf16 %v920_v35, %v919_v34  ;;  %v849_v39 = vadd.f32 %v2321_v33, %v848_v36 }
 0x181   : > { %v1665_v38 = vpop.f32.mrf.mxu0 }
 0x182   : > { %1768 = vmatmul.mubr.msk.bf16.gmra.mxu1 %vm993_vm4, %v949_v37  ;;  %v921_v43 = vmax.f32 %v849_v39, 0.0 }
 0x183   : > { %v851_v40 = vpop.f32.mrf.mxu0  ;;  %1771 = vmatprep.mubr.msk.bf16.mxu1 %vm1813_vm2, %v1811_v1 }
 0x184   : > { %v852_v41 = vadd.f32 %v2321_v33, %v851_v40 }
 0x185   : > { %v1666_v42 = vpop.f32.mrf.mxu0 }
 0x186   : > { %v922_v44 = vmax.f32 %v852_v41, 0.0 }
 0x187   : > { %v856_v45 = vpop.f32.mrf.mxu0 }
 0x188   : > { %v950_v46 = vpack.c.bf16 %v922_v44, %v921_v43  ;;  %v857_v48 = vadd.f32 %v2321_v33, %v856_v45 }
 0x189   : > { %v1669_v47 = vpop.f32.mrf.mxu0 }
 0x18a   : > { %1772 = vmatmul.mubr.msk.bf16.gmra.mxu1 %vm993_vm4, %v950_v46  ;;  %v923_v52 = vmax.f32 %v857_v48, 0.0 }
 0x18b   : > { %v859_v49 = vpop.f32.mrf.mxu0  ;;  %1775 = vmatprep.mubr.msk.bf16.mxu1 %vm1813_vm2, %v1811_v1 }
 0x18c   : > { %v860_v50 = vadd.f32 %v2321_v33, %v859_v49 }
 0x18d   : > { %v1670_v51 = vpop.f32.mrf.mxu0 }
 0x18e   : > { %v924_v53 = vmax.f32 %v860_v50, 0.0 }
 0x18f   : > { %v864_v54 = vpop.f32.mrf.mxu0 }
 0x190   : > { %v951_v55 = vpack.c.bf16 %v924_v53, %v923_v52  ;;  %v865_v57 = vadd.f32 %v2321_v33, %v864_v54 }
 0x191   : > { %v1673_v56 = vpop.f32.mrf.mxu0 }
 0x192   : > { %1776 = vmatmul.mubr.msk.bf16.gmra.mxu1 %vm993_vm4, %v951_v55  ;;  %v925_v61 = vmax.f32 %v865_v57, 0.0 }
 0x193   : > { %v867_v58 = vpop.f32.mrf.mxu0  ;;  %1779 = vmatprep.mubr.msk.bf16.mxu1 %vm1813_vm2, %v1811_v1 }
 0x194   : > { %v868_v59 = vadd.f32 %v2321_v33, %v867_v58 }
 0x195   : > { %v1674_v60 = vpop.f32.mrf.mxu0 }
 0x196   : > { %v926_v62 = vmax.f32 %v868_v59, 0.0 }
 0x197   : > { %v872_v63 = vpop.f32.mrf.mxu0 }
 0x198   : > { %v952_v0 = vpack.c.bf16 %v926_v62, %v925_v61  ;;  %v873_v3 = vadd.f32 %v2321_v33, %v872_v63 }
 0x199   : > { %v1677_v2 = vpop.f32.mrf.mxu0 }
 0x19a   : > { %1780 = vmatmul.mubr.msk.bf16.gmra.mxu1 %vm993_vm4, %v952_v0  ;;  %v927_v7 = vmax.f32 %v873_v3, 0.0 }
 0x19b   : > { %v875_v4 = vpop.f32.mrf.mxu0  ;;  %1783 = vmatprep.mubr.msk.bf16.mxu1 %vm1813_vm2, %v1811_v1 }
 0x19c   : > { %v876_v5 = vadd.f32 %v2321_v33, %v875_v4 }
 0x19d   : > { %v1678_v6 = vpop.f32.mrf.mxu0 }
 0x19e   : > { %v928_v8 = vmax.f32 %v876_v5, 0.0 }
 0x1a0   : > { %v953_v9 = vpack.c.bf16 %v928_v8, %v927_v7 }
 0x1a2   : > { %v1103_v11 = vpop.f32.mrf.mxu1  ;;  %1784 = vmatmul.mubr.msk.bf16.gmra.mxu1 %vm993_vm4, %v953_v9 }
 0x1a3   : > { %v1104_v12 = vadd.f32 %v2449_v10, %v1103_v11 }
 0x1a4   : > { %v1689_v1 = vpop.f32.mrf.mxu1 }
 0x1a5   : > { %v1302_v33 = vmax.f32 %v1104_v12, 0.0 }
 0x1a6   : > { %v1106_v13 = vpop.f32.mrf.mxu1 }
 0x1a7   : > { %1352 = vst [vmem:[%s2458_s12] sm:$0xff] %v1302_v33  ;;  %v1107_v14 = vadd.f32 %v2449_v10, %v1106_v13 }
 0x1a8   : > { %v1690_v15 = vpop.f32.mrf.mxu1 }
 0x1a9   : > { %v1303_v16 = vmax.f32 %v1107_v14, 0.0 }
 0x1aa   : > { %v1111_v17 = vpop.f32.mrf.mxu1 }
 0x1ab   : > { %1353 = vst [vmem:[%s2458_s12 + $0x8] sm:$0xff] %v1303_v16  ;;  %v1112_v18 = vadd.f32 %v2449_v10, %v1111_v17 }
 0x1ac   : > { %v1693_v19 = vpop.f32.mrf.mxu1 }
 0x1ad   : > { %v1304_v20 = vmax.f32 %v1112_v18, 0.0 }
 0x1ae   : > { %v1114_v21 = vpop.f32.mrf.mxu1 }
 0x1af   : > { %1354 = vst [vmem:[%s2458_s12 + $0x10] sm:$0xff] %v1304_v20  ;;  %v1115_v22 = vadd.f32 %v2449_v10, %v1114_v21 }
 0x1b0   : > { %v1694_v23 = vpop.f32.mrf.mxu1 }
 0x1b1   : > { %v1305_v24 = vmax.f32 %v1115_v22, 0.0 }
 0x1b2   : > { %v1119_v25 = vpop.f32.mrf.mxu1 }
 0x1b3   : > { %1355 = vst [vmem:[%s2458_s12 + $0x18] sm:$0xff] %v1305_v24  ;;  %v1120_v26 = vadd.f32 %v2449_v10, %v1119_v25 }
 0x1b4   : > { %v1697_v27 = vpop.f32.mrf.mxu1 }
 0x1b5   : > { %v1306_v28 = vmax.f32 %v1120_v26, 0.0 }
 0x1b6   : > { %v1122_v29 = vpop.f32.mrf.mxu1 }
 0x1b7   : > { %1356 = vst [vmem:[%s2458_s12 + $0x20] sm:$0xff] %v1306_v28  ;;  %v1123_v30 = vadd.f32 %v2449_v10, %v1122_v29 }
 0x1b8   : > { %v1698_v31 = vpop.f32.mrf.mxu1 }
 0x1b9   : > { %v1307_v32 = vmax.f32 %v1123_v30, 0.0 }
 0x1ba   : > { %v1127_v34 = vpop.f32.mrf.mxu1 }
 0x1bb   : > { %1357 = vst [vmem:[%s2458_s12 + $0x28] sm:$0xff] %v1307_v32  ;;  %v1128_v35 = vadd.f32 %v2449_v10, %v1127_v34 }
 0x1bc   : > { %v1701_v36 = vpop.f32.mrf.mxu1 }
 0x1bd   : > { %v1308_v37 = vmax.f32 %v1128_v35, 0.0 }
 0x1be   : > { %v1130_v38 = vpop.f32.mrf.mxu1 }
 0x1bf   : > { %1358 = vst [vmem:[%s2458_s12 + $0x30] sm:$0xff] %v1308_v37  ;;  %v1131_v39 = vadd.f32 %v2449_v10, %v1130_v38 }
 0x1c0   : > { %v1702_v40 = vpop.f32.mrf.mxu1 }
 0x1c1   : > { %v1309_v41 = vmax.f32 %v1131_v39, 0.0 }
 0x1c2   : > { %v1135_v42 = vpop.f32.mrf.mxu1 }
 0x1c3   : > { %1359 = vst [vmem:[%s2458_s12 + $0x38] sm:$0xff] %v1309_v41  ;;  %v1136_v43 = vadd.f32 %v2449_v10, %v1135_v42 }
 0x1c4   : > { %v1705_v44 = vpop.f32.mrf.mxu1 }
 0x1c5   : > { %v1310_v45 = vmax.f32 %v1136_v43, 0.0 }
 0x1c6   : > { %v1138_v46 = vpop.f32.mrf.mxu1 }
 0x1c7   : > { %1360 = vst [vmem:[%s2458_s12 + $0x40] sm:$0xff] %v1310_v45  ;;  %v1139_v47 = vadd.f32 %v2449_v10, %v1138_v46 }
 0x1c8   : > { %v1706_v48 = vpop.f32.mrf.mxu1 }
 0x1c9   : > { %v1311_v49 = vmax.f32 %v1139_v47, 0.0 }
 0x1ca   : > { %v1143_v50 = vpop.f32.mrf.mxu1 }
 0x1cb   : > { %1361 = vst [vmem:[%s2458_s12 + $0x48] sm:$0xff] %v1311_v49  ;;  %v1144_v51 = vadd.f32 %v2449_v10, %v1143_v50 }
 0x1cc   : > { %v1709_v52 = vpop.f32.mrf.mxu1 }
 0x1cd   : > { %v1312_v53 = vmax.f32 %v1144_v51, 0.0 }
 0x1ce   : > { %v1146_v54 = vpop.f32.mrf.mxu1 }
 0x1cf   : > { %1362 = vst [vmem:[%s2458_s12 + $0x50] sm:$0xff] %v1312_v53  ;;  %v1147_v55 = vadd.f32 %v2449_v10, %v1146_v54 }
 0x1d0   : > { %v1710_v56 = vpop.f32.mrf.mxu1 }
 0x1d1   : > { %v1313_v57 = vmax.f32 %v1147_v55, 0.0 }
 0x1d2   : > { %v1151_v58 = vpop.f32.mrf.mxu1 }
 0x1d3   : > { %1363 = vst [vmem:[%s2458_s12 + $0x58] sm:$0xff] %v1313_v57  ;;  %v1152_v59 = vadd.f32 %v2449_v10, %v1151_v58 }
 0x1d4   : > { %v1713_v60 = vpop.f32.mrf.mxu1 }
 0x1d5   : > { %v1314_v61 = vmax.f32 %v1152_v59, 0.0 }
 0x1d6   : > { %v1154_v62 = vpop.f32.mrf.mxu1 }
 0x1d7   : > { %1364 = vst [vmem:[%s2458_s12 + $0x60] sm:$0xff] %v1314_v61  ;;  %v1155_v63 = vadd.f32 %v2449_v10, %v1154_v62 }
 0x1d8   : > { %v1714_v0 = vpop.f32.mrf.mxu1 }
 0x1d9   : > { %v1315_v2 = vmax.f32 %v1155_v63, 0.0 }
 0x1da   : > { %v1159_v3 = vpop.f32.mrf.mxu1 }
 0x1db   : > { %1365 = vst [vmem:[%s2458_s12 + $0x68] sm:$0xff] %v1315_v2  ;;  %v1160_v4 = vadd.f32 %v2449_v10, %v1159_v3 }
 0x1dc   : > { %v1717_v5 = vpop.f32.mrf.mxu1 }
 0x1dd   : > { %v1316_v6 = vmax.f32 %v1160_v4, 0.0 }
 0x1de   : > { %v1162_v7 = vpop.f32.mrf.mxu1 }
 0x1df   : > { %1366 = vst [vmem:[%s2458_s12 + $0x70] sm:$0xff] %v1316_v6  ;;  %v1163_v8 = vadd.f32 %v2449_v10, %v1162_v7 }
 0x1e0   : > { %v1718_v9 = vpop.f32.mrf.mxu1 }
 0x1e1   : > { %v1317_v11 = vmax.f32 %v1163_v8, 0.0 }
 0x1e2   : > { %v1167_v12 = vpop.f32.mrf.mxu1 }
 0x1e3   : > { %1367 = vst [vmem:[%s2458_s12 + $0x78] sm:$0xff] %v1317_v11  ;;  %v1168_v1 = vadd.f32 %v2449_v10, %v1167_v12 }
 0x1e4   : > { %v1721_v33 = vpop.f32.mrf.mxu1 }
 0x1e5   : > { %v1318_v13 = vmax.f32 %v1168_v1, 0.0 }
 0x1e6   : > { %v1170_v14 = vpop.f32.mrf.mxu1 }
 0x1e7   : > { %1368 = vst [vmem:[%s2458_s12 + $0x80] sm:$0xff] %v1318_v13  ;;  %v1171_v15 = vadd.f32 %v2449_v10, %v1170_v14 }
 0x1e8   : > { %v1722_v16 = vpop.f32.mrf.mxu1 }
 0x1e9   : > { %v1319_v17 = vmax.f32 %v1171_v15, 0.0 }
 0x1ea   : > { %v1175_v18 = vpop.f32.mrf.mxu1 }
 0x1eb   : > { %1369 = vst [vmem:[%s2458_s12 + $0x88] sm:$0xff] %v1319_v17  ;;  %v1176_v19 = vadd.f32 %v2449_v10, %v1175_v18 }
 0x1ec   : > { %v1725_v20 = vpop.f32.mrf.mxu1 }
 0x1ed   : > { %v1320_v21 = vmax.f32 %v1176_v19, 0.0 }
 0x1ee   : > { %v1178_v22 = vpop.f32.mrf.mxu1 }
 0x1ef   : > { %1370 = vst [vmem:[%s2458_s12 + $0x90] sm:$0xff] %v1320_v21  ;;  %v1179_v23 = vadd.f32 %v2449_v10, %v1178_v22 }
 0x1f0   : > { %v1726_v24 = vpop.f32.mrf.mxu1 }
 0x1f1   : > { %v1321_v25 = vmax.f32 %v1179_v23, 0.0 }
 0x1f2   : > { %v1183_v26 = vpop.f32.mrf.mxu1 }
 0x1f3   : > { %1371 = vst [vmem:[%s2458_s12 + $0x98] sm:$0xff] %v1321_v25  ;;  %v1184_v27 = vadd.f32 %v2449_v10, %v1183_v26 }
 0x1f4   : > { %v1729_v28 = vpop.f32.mrf.mxu1 }
 0x1f5   : > { %v1322_v29 = vmax.f32 %v1184_v27, 0.0 }
 0x1f6   : > { %v1186_v30 = vpop.f32.mrf.mxu1 }
 0x1f7   : > { %1372 = vst [vmem:[%s2458_s12 + $0xa0] sm:$0xff] %v1322_v29  ;;  %v1187_v31 = vadd.f32 %v2449_v10, %v1186_v30 }
 0x1f8   : > { %v1730_v32 = vpop.f32.mrf.mxu1 }
 0x1f9   : > { %v1323_v34 = vmax.f32 %v1187_v31, 0.0 }
 0x1fa   : > { %v1191_v35 = vpop.f32.mrf.mxu1 }
 0x1fb   : > { %1373 = vst [vmem:[%s2458_s12 + $0xa8] sm:$0xff] %v1323_v34  ;;  %v1192_v36 = vadd.f32 %v2449_v10, %v1191_v35 }
 0x1fc   : > { %v1733_v37 = vpop.f32.mrf.mxu1 }
 0x1fd   : > { %v1324_v38 = vmax.f32 %v1192_v36, 0.0 }
 0x1fe   : > { %v1194_v39 = vpop.f32.mrf.mxu1 }
 0x1ff   : > { %1374 = vst [vmem:[%s2458_s12 + $0xb0] sm:$0xff] %v1324_v38  ;;  %v1195_v40 = vadd.f32 %v2449_v10, %v1194_v39 }
 0x200   : > { %v1734_v41 = vpop.f32.mrf.mxu1 }
 0x201   : > { %v1325_v42 = vmax.f32 %v1195_v40, 0.0 }
 0x202   : > { %v1199_v43 = vpop.f32.mrf.mxu1 }
 0x203   : > { %1375 = vst [vmem:[%s2458_s12 + $0xb8] sm:$0xff] %v1325_v42  ;;  %v1200_v44 = vadd.f32 %v2449_v10, %v1199_v43 }
 0x204   : > { %v1737_v45 = vpop.f32.mrf.mxu1 }
 0x205   : > { %v1326_v46 = vmax.f32 %v1200_v44, 0.0 }
 0x206   : > { %v1202_v47 = vpop.f32.mrf.mxu1 }
 0x207   : > { %1376 = vst [vmem:[%s2458_s12 + $0xc0] sm:$0xff] %v1326_v46  ;;  %v1203_v48 = vadd.f32 %v2449_v10, %v1202_v47 }
 0x208   : > { %v1738_v49 = vpop.f32.mrf.mxu1 }
 0x209   : > { %v1327_v50 = vmax.f32 %v1203_v48, 0.0 }
 0x20a   : > { %v1207_v51 = vpop.f32.mrf.mxu1 }
 0x20b   : > { %1377 = vst [vmem:[%s2458_s12 + $0xc8] sm:$0xff] %v1327_v50  ;;  %v1208_v52 = vadd.f32 %v2449_v10, %v1207_v51 }
 0x20c   : > { %v1741_v53 = vpop.f32.mrf.mxu1 }
 0x20d   : > { %v1328_v54 = vmax.f32 %v1208_v52, 0.0 }
 0x20e   : > { %v1210_v55 = vpop.f32.mrf.mxu1 }
 0x20f   : > { %1378 = vst [vmem:[%s2458_s12 + $0xd0] sm:$0xff] %v1328_v54  ;;  %v1211_v56 = vadd.f32 %v2449_v10, %v1210_v55 }
 0x210   : > { %v1742_v57 = vpop.f32.mrf.mxu1 }
 0x211   : > { %v1329_v58 = vmax.f32 %v1211_v56, 0.0 }
 0x212   : > { %v1215_v59 = vpop.f32.mrf.mxu1 }
 0x213   : > { %1379 = vst [vmem:[%s2458_s12 + $0xd8] sm:$0xff] %v1329_v58  ;;  %v1216_v60 = vadd.f32 %v2449_v10, %v1215_v59 }
 0x214   : > { %v1745_v61 = vpop.f32.mrf.mxu1 }
 0x215   : > { %v1330_v62 = vmax.f32 %v1216_v60, 0.0 }
 0x216   : > { %v1218_v63 = vpop.f32.mrf.mxu1 }
 0x217   : > { %1380 = vst [vmem:[%s2458_s12 + $0xe0] sm:$0xff] %v1330_v62  ;;  %v1219_v0 = vadd.f32 %v2449_v10, %v1218_v63 }
 0x218   : > { %v1746_v2 = vpop.f32.mrf.mxu1 }
 0x219   : > { %v1331_v3 = vmax.f32 %v1219_v0, 0.0 }
 0x21a   : > { %v1223_v4 = vpop.f32.mrf.mxu1 }
 0x21b   : > { %1381 = vst [vmem:[%s2458_s12 + $0xe8] sm:$0xff] %v1331_v3  ;;  %v1224_v5 = vadd.f32 %v2449_v10, %v1223_v4 }
 0x21c   : > { %v1749_v6 = vpop.f32.mrf.mxu1 }
 0x21d   : > { %v1332_v7 = vmax.f32 %v1224_v5, 0.0 }
 0x21e   : > { %v1226_v8 = vpop.f32.mrf.mxu1 }
 0x21f   : > { %1382 = vst [vmem:[%s2458_s12 + $0xf0] sm:$0xff] %v1332_v7  ;;  %v1227_v9 = vadd.f32 %v2449_v10, %v1226_v8 }
 0x220   : > { %v1750_v11 = vpop.f32.mrf.mxu1 }
 0x221   : > { %v1333_v12 = vmax.f32 %v1227_v9, 0.0 }
 0x222   : > { %v1231_v1 = vpop.f32.mrf.mxu1 }
 0x223   : > { %1383 = vst [vmem:[%s2458_s12 + $0xf8] sm:$0xff] %v1333_v12  ;;  %v1232_v33 = vadd.f32 %v2449_v10, %v1231_v1 }
 0x224   : > { %v1753_v13 = vpop.f32.mrf.mxu1 }
 0x225   : > { %v1334_v14 = vmax.f32 %v1232_v33, 0.0 }
 0x226   : > { %v1234_v15 = vpop.f32.mrf.mxu1 }
 0x227   : > { %1384 = vst [vmem:[%s2458_s12 + $0x100] sm:$0xff] %v1334_v14  ;;  %v1235_v16 = vadd.f32 %v2449_v10, %v1234_v15 }
 0x228   : > { %v1754_v17 = vpop.f32.mrf.mxu1 }
 0x229   : > { %v1335_v18 = vmax.f32 %v1235_v16, 0.0 }
 0x22a   : > { %v1239_v19 = vpop.f32.mrf.mxu1 }
 0x22b   : > { %1385 = vst [vmem:[%s2458_s12 + $0x108] sm:$0xff] %v1335_v18  ;;  %v1240_v20 = vadd.f32 %v2449_v10, %v1239_v19 }
 0x22c   : > { %v1757_v21 = vpop.f32.mrf.mxu1 }
 0x22d   : > { %v1336_v22 = vmax.f32 %v1240_v20, 0.0 }
 0x22e   : > { %v1242_v23 = vpop.f32.mrf.mxu1 }
 0x22f   : > { %1386 = vst [vmem:[%s2458_s12 + $0x110] sm:$0xff] %v1336_v22  ;;  %v1243_v24 = vadd.f32 %v2449_v10, %v1242_v23 }
 0x230   : > { %v1758_v25 = vpop.f32.mrf.mxu1 }
 0x231   : > { %v1337_v26 = vmax.f32 %v1243_v24, 0.0 }
 0x232   : > { %v1247_v27 = vpop.f32.mrf.mxu1 }
 0x233   : > { %1387 = vst [vmem:[%s2458_s12 + $0x118] sm:$0xff] %v1337_v26  ;;  %v1248_v28 = vadd.f32 %v2449_v10, %v1247_v27 }
 0x234   : > { %v1761_v29 = vpop.f32.mrf.mxu1 }
 0x235   : > { %v1338_v30 = vmax.f32 %v1248_v28, 0.0 }
 0x236   : > { %v1250_v31 = vpop.f32.mrf.mxu1 }
 0x237   : > { %1388 = vst [vmem:[%s2458_s12 + $0x120] sm:$0xff] %v1338_v30  ;;  %v1251_v32 = vadd.f32 %v2449_v10, %v1250_v31 }
 0x238   : > { %v1762_v34 = vpop.f32.mrf.mxu1 }
 0x239   : > { %v1339_v35 = vmax.f32 %v1251_v32, 0.0 }
 0x23a   : > { %v1255_v36 = vpop.f32.mrf.mxu1 }
 0x23b   : > { %1389 = vst [vmem:[%s2458_s12 + $0x128] sm:$0xff] %v1339_v35  ;;  %v1256_v37 = vadd.f32 %v2449_v10, %v1255_v36 }
 0x23c   : > { %v1765_v38 = vpop.f32.mrf.mxu1 }
 0x23d   : > { %v1340_v39 = vmax.f32 %v1256_v37, 0.0 }
 0x23e   : > { %v1258_v40 = vpop.f32.mrf.mxu1 }
 0x23f   : > { %1390 = vst [vmem:[%s2458_s12 + $0x130] sm:$0xff] %v1340_v39  ;;  %v1259_v41 = vadd.f32 %v2449_v10, %v1258_v40 }
 0x240   : > { %v1766_v42 = vpop.f32.mrf.mxu1 }
 0x241   : > { %v1341_v43 = vmax.f32 %v1259_v41, 0.0 }
 0x242   : > { %v1263_v44 = vpop.f32.mrf.mxu1 }
 0x243   : > { %1391 = vst [vmem:[%s2458_s12 + $0x138] sm:$0xff] %v1341_v43  ;;  %v1264_v45 = vadd.f32 %v2449_v10, %v1263_v44 }
 0x244   : > { %v1769_v46 = vpop.f32.mrf.mxu1 }
 0x245   : > { %v1342_v47 = vmax.f32 %v1264_v45, 0.0 }
 0x246   : > { %v1266_v48 = vpop.f32.mrf.mxu1 }
 0x247   : > { %1392 = vst [vmem:[%s2458_s12 + $0x140] sm:$0xff] %v1342_v47  ;;  %v1267_v49 = vadd.f32 %v2449_v10, %v1266_v48 }
 0x248   : > { %v1770_v50 = vpop.f32.mrf.mxu1 }
 0x249   : > { %v1343_v51 = vmax.f32 %v1267_v49, 0.0 }
 0x24a   : > { %v1271_v52 = vpop.f32.mrf.mxu1 }
 0x24b   : > { %1393 = vst [vmem:[%s2458_s12 + $0x148] sm:$0xff] %v1343_v51  ;;  %v1272_v53 = vadd.f32 %v2449_v10, %v1271_v52 }
 0x24c   : > { %v1773_v54 = vpop.f32.mrf.mxu1 }
 0x24d   : > { %v1344_v55 = vmax.f32 %v1272_v53, 0.0 }
 0x24e   : > { %v1274_v56 = vpop.f32.mrf.mxu1 }
 0x24f   : > { %1394 = vst [vmem:[%s2458_s12 + $0x150] sm:$0xff] %v1344_v55  ;;  %v1275_v57 = vadd.f32 %v2449_v10, %v1274_v56 }
 0x250   : > { %v1774_v58 = vpop.f32.mrf.mxu1 }
 0x251   : > { %v1345_v59 = vmax.f32 %v1275_v57, 0.0 }
 0x252   : > { %v1279_v60 = vpop.f32.mrf.mxu1 }
 0x253   : > { %1395 = vst [vmem:[%s2458_s12 + $0x158] sm:$0xff] %v1345_v59  ;;  %v1280_v61 = vadd.f32 %v2449_v10, %v1279_v60 }
 0x254   : > { %v1777_v62 = vpop.f32.mrf.mxu1 }
 0x255   : > { %v1346_v63 = vmax.f32 %v1280_v61, 0.0 }
 0x256   : > { %v1282_v0 = vpop.f32.mrf.mxu1 }
 0x257   : > { %1396 = vst [vmem:[%s2458_s12 + $0x160] sm:$0xff] %v1346_v63  ;;  %v1283_v2 = vadd.f32 %v2449_v10, %v1282_v0 }
 0x258   : > { %v1778_v3 = vpop.f32.mrf.mxu1 }
 0x259   : > { %v1347_v4 = vmax.f32 %v1283_v2, 0.0 }
 0x25a   : > { %v1287_v5 = vpop.f32.mrf.mxu1 }
 0x25b   : > { %1397 = vst [vmem:[%s2458_s12 + $0x168] sm:$0xff] %v1347_v4  ;;  %v1288_v6 = vadd.f32 %v2449_v10, %v1287_v5 }
 0x25c   : > { %v1781_v7 = vpop.f32.mrf.mxu1 }
 0x25d   : > { %v1348_v8 = vmax.f32 %v1288_v6, 0.0 }
 0x25e   : > { %v1290_v9 = vpop.f32.mrf.mxu1 }
 0x25f   : > { %1398 = vst [vmem:[%s2458_s12 + $0x170] sm:$0xff] %v1348_v8  ;;  %v1291_v11 = vadd.f32 %v2449_v10, %v1290_v9 }
 0x260   : > { %v1782_v12 = vpop.f32.mrf.mxu1 }
 0x261   : > { %v1349_v1 = vmax.f32 %v1291_v11, 0.0 }
 0x262   : > { %v1295_v33 = vpop.f32.mrf.mxu1 }
 0x263   : > { %1399 = vst [vmem:[%s2458_s12 + $0x178] sm:$0xff] %v1349_v1  ;;  %v1296_v13 = vadd.f32 %v2449_v10, %v1295_v33 }
 0x264   : > { %v1785_v14 = vpop.f32.mrf.mxu1 }
 0x265   : > { %v1350_v15 = vmax.f32 %v1296_v13, 0.0 }
 0x266   : > { %v1298_v16 = vpop.f32.mrf.mxu1 }
 0x267   : > { %1400 = vst [vmem:[%s2458_s12 + $0x180] sm:$0xff] %v1350_v15  ;;  %v1299_v17 = vadd.f32 %v2449_v10, %v1298_v16 }
 0x268   : > { %v1786_v18 = vpop.f32.mrf.mxu1 }
 0x269   : > { %v1351_v19 = vmax.f32 %v1299_v17, 0.0 }
 0x26b   : > { %1401 = vst [vmem:[%s2458_s12 + $0x188] sm:$0xff] %v1351_v19 }
 0x26c PF: > { %s17_s24 = sadd.s32 1, %s1809_s24  }
 0x26d   : > { %p14_p4 = scmp.ge.s32.totalorder %s17_s24, 4  }
 0x26f   :  { %16 = sbr.rel (!%p14_p4) target bundleno = 1 (0x1), region = 78 }

</bundles_post_ra>
